<compile_context>
chip_gen: v6e
topology: v6e:2x2x1
jax: 0.10.0
libtpu: 0.0.40
codegen_flags: <defaults>
</compile_context>

<pallas_src>
import math

import jax
import jax.numpy as jnp
from jax.experimental import pallas as pl
from jax.experimental.pallas import tpu as pltpu


def _round_up(v, m):
    return ((v + m - 1) // m) * m


def _f2_kernel(x_ref, w0_ref, b0_ref, w1_ref, b1_ref, w2_ref, b2_ref, o_ref):
    # Layer 0: MXU matmul with fp32 accumulation, fp32 bias add + ReLU on VPU.
    x = x_ref[...]
    a0 = jnp.dot(x, w0_ref[...], preferred_element_type=jnp.float32)
    a0 = jnp.maximum(a0 + b0_ref[...], 0.0)          # b0_ref is (1, h0) fp32
    # Layer 1.
    a1 = jnp.dot(a0.astype(w1_ref.dtype), w1_ref[...],
                 preferred_element_type=jnp.float32)
    a1 = jnp.maximum(a1 + b1_ref[...], 0.0)          # b1_ref is (1, h1) fp32
    # Layer 2 (no activation).
    o = jnp.dot(a1.astype(w2_ref.dtype), w2_ref[...],
                preferred_element_type=jnp.float32)
    o_ref[...] = (o + b2_ref[...]).astype(o_ref.dtype)


def f2_forward(x, w0, b0, w1, b1, w2, b2, *, tile_n=256,
               compute_dtype=jnp.float32):
    """Pallas F2 forward pass. Returns (n, k) float32."""
    n, d = x.shape
    h0 = w0.shape[1]
    h1 = w1.shape[1]
    k = w2.shape[1]

    # MXU/lane-friendly padded dims (128-multiples); rows to a multiple of 8.
    d_p = _round_up(d, 128)
    h0_p = _round_up(h0, 128)
    h1_p = _round_up(h1, 128)
    k_p = _round_up(k, 128)
    tile_n = max(8, _round_up(min(tile_n, _round_up(n, 8)), 8))
    n_p = _round_up(n, tile_n)

    # Zero-padding is mathematically neutral (see header comment).
    xp = jnp.zeros((n_p, d_p), compute_dtype).at[:n, :d].set(
        x.astype(compute_dtype))
    w0p = jnp.zeros((d_p, h0_p), compute_dtype).at[:d, :h0].set(
        w0.astype(compute_dtype))
    w1p = jnp.zeros((h0_p, h1_p), compute_dtype).at[:h0, :h1].set(
        w1.astype(compute_dtype))
    w2p = jnp.zeros((h1_p, k_p), compute_dtype).at[:h1, :k].set(
        w2.astype(compute_dtype))
    # Biases stay fp32 regardless of compute dtype (fp32 elementwise path).
    b0p = jnp.zeros((1, h0_p), jnp.float32).at[0, :h0].set(b0.astype(jnp.float32))
    b1p = jnp.zeros((1, h1_p), jnp.float32).at[0, :h1].set(b1.astype(jnp.float32))
    b2p = jnp.zeros((1, k_p), jnp.float32).at[0, :k].set(b2.astype(jnp.float32))

    grid = (n_p // tile_n,)
    itemsize = jnp.dtype(compute_dtype).itemsize
    cost = pl.CostEstimate(
        flops=2 * n_p * (d_p * h0_p + h0_p * h1_p + h1_p * k_p),
        transcendentals=0,
        bytes_accessed=(xp.size + w0p.size + w1p.size + w2p.size) * itemsize
        + (b0p.size + b1p.size + b2p.size + n_p * k_p) * 4,
    )

    out_p = pl.pallas_call(
        _f2_kernel,
        out_shape=jax.ShapeDtypeStruct((n_p, k_p), jnp.float32),
        grid=grid,
        in_specs=[
            pl.BlockSpec((tile_n, d_p), lambda i: (i, 0)),   # x streamed by rows
            pl.BlockSpec((d_p, h0_p), lambda i: (0, 0)),     # weights resident
            pl.BlockSpec((1, h0_p), lambda i: (0, 0)),
            pl.BlockSpec((h0_p, h1_p), lambda i: (0, 0)),
            pl.BlockSpec((1, h1_p), lambda i: (0, 0)),
            pl.BlockSpec((h1_p, k_p), lambda i: (0, 0)),
            pl.BlockSpec((1, k_p), lambda i: (0, 0)),
        ],
        out_specs=pl.BlockSpec((tile_n, k_p), lambda i: (i, 0)),
        compiler_params=pltpu.CompilerParams(
            dimension_semantics=("parallel",),               # megacore on v7x
        ),
        cost_estimate=cost,
    )(xp, w0p, b0p, w1p, b1p, w2p, b2p)

    return out_p[:n, :k]


def init_f2_params(key, d, h0, h1, k):
    """Matches the PyTorch init: per-layer U(-a, a) for weights and biases."""
    a0 = 1.0 / math.sqrt(d)
    a1 = 1.0 / math.sqrt(h0)
    a2 = 1.0 / math.sqrt(h1)
    k0, k1, k2, k3, k4, k5 = jax.random.split(key, 6)
    w0 = jax.random.uniform(k0, (d, h0), jnp.float32, minval=-a0, maxval=a0)
    b0 = jax.random.uniform(k1, (h0,), jnp.float32, minval=-a0, maxval=a0)
    w1 = jax.random.uniform(k2, (h0, h1), jnp.float32, minval=-a1, maxval=a1)
    b1 = jax.random.uniform(k3, (h1,), jnp.float32, minval=-a1, maxval=a1)
    w2 = jax.random.uniform(k4, (h1, k), jnp.float32, minval=-a2, maxval=a2)
    b2 = jax.random.uniform(k5, (k,), jnp.float32, minval=-a2, maxval=a2)
    return w0, b0, w1, b1, w2, b2


if __name__ == "__main__":
    # MNIST-style F2 shapes: d=784 features, h0=64, h1=32, k=10 classes.
    n, d, h0, h1, k = 512, 784, 64, 32, 10

    key = jax.random.PRNGKey(0)
    kx, kp = jax.random.split(key)
    x = jax.random.normal(kx, (n, d), jnp.float32)
    w0, b0, w1, b1, w2, b2 = init_f2_params(kp, d, h0, h1, k)

    # Plain-JAX reference of the PyTorch forward.
    ref = jnp.maximum(jnp.maximum(x @ w0 + b0, 0.0) @ w1 + b1, 0.0) @ w2 + b2

    # fp32 compute path. Tolerance accounts for TPU MXU default-precision f32
    # matmuls possibly differing between XLA's reference and the Pallas kernel.
    out = jax.block_until_ready(f2_forward(x, w0, b0, w1, b1, w2, b2))
    assert out.shape == (n, k)
    assert jnp.allclose(out, ref, atol=5e-2, rtol=5e-2)

    # bf16 inputs/weights (v6e/v7x MXU fast path), fp32 accumulation and fp32
    # bias/ReLU inside the kernel — looser tolerance for the bf16 input cast.
    out_bf16 = jax.block_until_ready(
        f2_forward(x, w0, b0, w1, b1, w2, b2, compute_dtype=jnp.bfloat16))
    assert out_bf16.shape == (n, k)
    assert jnp.allclose(out_bf16, ref, atol=1e-1, rtol=1e-1)

    print("KERNEL_OK")
</pallas_src>

<mosaic_0001>
module attributes {stable_mosaic.version = 11 : i64} {
  func.func @_f2_kernel(%arg0: i32, %arg1: memref<256x896xf32, #tpu.memory_space<vmem>>, %arg2: memref<896x128xf32, #tpu.memory_space<vmem>>, %arg3: memref<1x128xf32, #tpu.memory_space<vmem>>, %arg4: memref<128x128xf32, #tpu.memory_space<vmem>>, %arg5: memref<1x128xf32, #tpu.memory_space<vmem>>, %arg6: memref<128x128xf32, #tpu.memory_space<vmem>>, %arg7: memref<1x128xf32, #tpu.memory_space<vmem>>, %arg8: memref<256x128xf32, #tpu.memory_space<vmem>>) attributes {dimension_semantics = [#tpu.dimension_semantics<parallel>], iteration_bounds = array<i64: 2>, scalar_prefetch = 0 : i64, scratch_operands = 0 : i64, tpu.core_type = #tpu.core_type<tc>, window_params = [{transform_indices = @transform_0, window_bounds = array<i64: 256, 896>}, {pipeline_mode = #tpu.pipeline_mode<synchronous>, transform_indices = @transform_1, window_bounds = array<i64: 896, 128>}, {pipeline_mode = #tpu.pipeline_mode<synchronous>, transform_indices = @transform_2, window_bounds = array<i64: 1, 128>}, {pipeline_mode = #tpu.pipeline_mode<synchronous>, transform_indices = @transform_3, window_bounds = array<i64: 128, 128>}, {pipeline_mode = #tpu.pipeline_mode<synchronous>, transform_indices = @transform_4, window_bounds = array<i64: 1, 128>}, {pipeline_mode = #tpu.pipeline_mode<synchronous>, transform_indices = @transform_5, window_bounds = array<i64: 128, 128>}, {pipeline_mode = #tpu.pipeline_mode<synchronous>, transform_indices = @transform_6, window_bounds = array<i64: 1, 128>}, {transform_indices = @transform_7, window_bounds = array<i64: 256, 128>}]} {
    %c0 = arith.constant 0 : index
    %c0_0 = arith.constant 0 : index
    %0 = vector.load %arg1[%c0, %c0_0] : memref<256x896xf32, #tpu.memory_space<vmem>>, vector<256x896xf32>
    %c0_1 = arith.constant 0 : index
    %c0_2 = arith.constant 0 : index
    %1 = vector.load %arg2[%c0_1, %c0_2] : memref<896x128xf32, #tpu.memory_space<vmem>>, vector<896x128xf32>
    %cst = arith.constant dense<0.000000e+00> : vector<256x128xf32>
    %2 = tpu.matmul %0, %1, %cst {dimension_numbers = #tpu.dot_dimension_numbers<[1], [0], [0], [1], [0, 0, 1, 1], [], []>} : vector<256x896xf32>, vector<896x128xf32>, vector<256x128xf32> -> vector<256x128xf32>
    %c0_3 = arith.constant 0 : index
    %c0_4 = arith.constant 0 : index
    %3 = vector.load %arg3[%c0_3, %c0_4] : memref<1x128xf32, #tpu.memory_space<vmem>>, vector<1x128xf32>
    %4 = vector.broadcast %3 : vector<1x128xf32> to vector<256x128xf32>
    %5 = arith.addf %2, %4 : vector<256x128xf32>
    %cst_5 = arith.constant 0.000000e+00 : f32
    %6 = vector.broadcast %cst_5 : f32 to vector<256x128xf32>
    %7 = arith.maximumf %5, %6 : vector<256x128xf32>
    %c0_6 = arith.constant 0 : index
    %c0_7 = arith.constant 0 : index
    %8 = vector.load %arg4[%c0_6, %c0_7] : memref<128x128xf32, #tpu.memory_space<vmem>>, vector<128x128xf32>
    %cst_8 = arith.constant dense<0.000000e+00> : vector<256x128xf32>
    %9 = tpu.matmul %7, %8, %cst_8 {dimension_numbers = #tpu.dot_dimension_numbers<[1], [0], [0], [1], [0, 0, 1, 1], [], []>} : vector<256x128xf32>, vector<128x128xf32>, vector<256x128xf32> -> vector<256x128xf32>
    %c0_9 = arith.constant 0 : index
    %c0_10 = arith.constant 0 : index
    %10 = vector.load %arg5[%c0_9, %c0_10] : memref<1x128xf32, #tpu.memory_space<vmem>>, vector<1x128xf32>
    %11 = vector.broadcast %10 : vector<1x128xf32> to vector<256x128xf32>
    %12 = arith.addf %9, %11 : vector<256x128xf32>
    %cst_11 = arith.constant 0.000000e+00 : f32
    %13 = vector.broadcast %cst_11 : f32 to vector<256x128xf32>
    %14 = arith.maximumf %12, %13 : vector<256x128xf32>
    %c0_12 = arith.constant 0 : index
    %c0_13 = arith.constant 0 : index
    %15 = vector.load %arg6[%c0_12, %c0_13] : memref<128x128xf32, #tpu.memory_space<vmem>>, vector<128x128xf32>
    %cst_14 = arith.constant dense<0.000000e+00> : vector<256x128xf32>
    %16 = tpu.matmul %14, %15, %cst_14 {dimension_numbers = #tpu.dot_dimension_numbers<[1], [0], [0], [1], [0, 0, 1, 1], [], []>} : vector<256x128xf32>, vector<128x128xf32>, vector<256x128xf32> -> vector<256x128xf32>
    %c0_15 = arith.constant 0 : index
    %c0_16 = arith.constant 0 : index
    %17 = vector.load %arg7[%c0_15, %c0_16] : memref<1x128xf32, #tpu.memory_space<vmem>>, vector<1x128xf32>
    %18 = vector.broadcast %17 : vector<1x128xf32> to vector<256x128xf32>
    %19 = arith.addf %16, %18 : vector<256x128xf32>
    %c0_17 = arith.constant 0 : index
    %c0_18 = arith.constant 0 : index
    %20 = vector.load %arg8[%c0_17, %c0_18] : memref<256x128xf32, #tpu.memory_space<vmem>>, vector<256x128xf32>
    tpu.vector_store %arg8[%c0_17, %c0_18], %19 {strides = array<i32>} : memref<256x128xf32, #tpu.memory_space<vmem>>, vector<256x128xf32>,
    return
  }
  func.func @transform_0(%arg0: i32) -> (i32, i32) {
    %c0_i32 = arith.constant 0 : i32
    %c0_i32_0 = arith.constant 0 : i32
    return %arg0, %c0_i32 : i32, i32
  }
  func.func @transform_1(%arg0: i32) -> (i32, i32) {
    %c0_i32 = arith.constant 0 : i32
    %c0_i32_0 = arith.constant 0 : i32
    %c0_i32_1 = arith.constant 0 : i32
    return %c0_i32, %c0_i32_0 : i32, i32
  }
  func.func @transform_2(%arg0: i32) -> (i32, i32) {
    %c0_i32 = arith.constant 0 : i32
    %c0_i32_0 = arith.constant 0 : i32
    %c0_i32_1 = arith.constant 0 : i32
    return %c0_i32, %c0_i32_0 : i32, i32
  }
  func.func @transform_3(%arg0: i32) -> (i32, i32) {
    %c0_i32 = arith.constant 0 : i32
    %c0_i32_0 = arith.constant 0 : i32
    %c0_i32_1 = arith.constant 0 : i32
    return %c0_i32, %c0_i32_0 : i32, i32
  }
  func.func @transform_4(%arg0: i32) -> (i32, i32) {
    %c0_i32 = arith.constant 0 : i32
    %c0_i32_0 = arith.constant 0 : i32
    %c0_i32_1 = arith.constant 0 : i32
    return %c0_i32, %c0_i32_0 : i32, i32
  }
  func.func @transform_5(%arg0: i32) -> (i32, i32) {
    %c0_i32 = arith.constant 0 : i32
    %c0_i32_0 = arith.constant 0 : i32
    %c0_i32_1 = arith.constant 0 : i32
    return %c0_i32, %c0_i32_0 : i32, i32
  }
  func.func @transform_6(%arg0: i32) -> (i32, i32) {
    %c0_i32 = arith.constant 0 : i32
    %c0_i32_0 = arith.constant 0 : i32
    %c0_i32_1 = arith.constant 0 : i32
    return %c0_i32, %c0_i32_0 : i32, i32
  }
  func.func @transform_7(%arg0: i32) -> (i32, i32) {
    %c0_i32 = arith.constant 0 : i32
    %c0_i32_0 = arith.constant 0 : i32
    return %arg0, %c0_i32 : i32, i32
  }
}

</mosaic_0001>

<bundles_post_ra>
// kernel: tpu_custom_call.1
= control target key start
LH: loop header
LB: loop body
LE: loop exit
PB: predicated region body
PF: predicated region fallthrough
CT: control target
= control target key end

     0   :  { %s4118_s0 = inlined_call_operand.hbm [shape: f32[512,896], index: 0, kind: input, shape index: {}]   ;;  %s4119_s1 = inlined_call_operand.hbm [shape: f32[896,128], index: 1, kind: input, shape index: {}]   ;;  %s4120_s2 = inlined_call_operand.hbm [shape: f32[1,128], index: 2, kind: input, shape index: {}]   ;;  %s4121_s3 = inlined_call_operand.hbm [shape: f32[128,128], index: 3, kind: input, shape index: {}]   ;;  %s4122_s4 = inlined_call_operand.hbm [shape: f32[1,128], index: 4, kind: input, shape index: {}]   ;;  %s4123_s5 = inlined_call_operand.hbm [shape: f32[128,128], index: 5, kind: input, shape index: {}]   ;;  %s4124_s6 = inlined_call_operand.hbm [shape: f32[1,128], index: 6, kind: input, shape index: {}]   ;;  %s4125_s7 = inlined_call_operand.hbm [shape: f32[512,128], index: 7, kind: output, shape index: {}]  }
   0x1   :  { %4130 = sst [smem:[#allocation20_spill]] %s4119_s1 }
   0x2   :  { %12 = vsyncpa [#allocation3], 0 }
   0x3   :  { %14 = vsyncpa [#allocation3 + $0x1], 0 }
   0x4   :  { %15 = vsyncpa [#allocation6], 0 }
   0x5   :  { %16 = vsyncpa [#allocation9], 0 }
   0x6   :  { %17 = vsyncpa [#allocation12], 0 }
   0x7   :  { %18 = vsyncpa [#allocation4], 0 }
   0x8   :  { %20 = vsyncpa [#allocation4 + $0x1], 0  ;;  %s3271_s24 = smov 0   ;;  %s3273_s25 = smov 0  }
   0x9   :  { %s3275_s26 = smov 0   ;;  %s3277_s27 = smov 0  }
   0xa LB: > { %s3216_s28 = smov [#allocation5]   ;;  %s3292_s30 = sadd.s32 4294967295, %s3214_s27   ;;  %s3214_s27 = sphi %s3277_s27, %s4154_s27   ;;  %s3210_s26 = sphi %s3275_s26, %s4153_s26   ;;  %s3206_s25 = sphi %s3273_s25, %s4152_s25   ;;  %s3202_s24 = sphi %s3271_s24, %s4151_s24  }
   0xb   : > { %s221_s29 = sshll.u32 %s3216_s28, 4  ;;  %p2361_p0 = scmp.ge.s32.totalorder %s3214_s27, 1  ;;  %s222_s29 = int_to_ptr.vmem [resolvable:$true] %s221_s29 }
   0xc   : > { %p4126_p1 = scmp.eq.s32.totalorder %s3292_s30, 0  ;;  %p209_p2 = scmp.lt.s32.totalorder %s3214_s27, 3 }
   0xd   : > { %s3217_s9 = smov [#allocation8]   ;;  %s3218_s12 = smov [#allocation11]  }
   0xe   : > { %p3297_p3 = pnand %p2361_p0, %p209_p2  ;;  %s245_s10 = sshll.u32 %s3217_s9, 4  ;;  %s3310_s10 = int_to_ptr.vmem [resolvable:$true] %s245_s10 }
   0xf   : > { %s269_s13 = sshll.u32 %s3218_s12, 4  ;;  %s2965_s15 = scalar_lea.vmem %s222_s29, 14336  ;;  %s3312_s13 = int_to_ptr.vmem [resolvable:$true] %s269_s13 }
  0x10   : > { %s4131_s8 = scalar_select %p3297_p3, 1, 0 }
  0x11   : > { %p2868_p5 = pneg %p3297_p3  ;;  %p2966_p8 = scmp.ne.s32.totalorder %s222_s29, %s2965_s15 }
  0x12   : > { %p2973_p11 = scmp.lt.s32.totalorder %s222_s29, %s222_s29  ;;  %p2974_p12 = scmp.lt.s32.totalorder %s2965_s15, %s2965_s15 }
  0x13   : > { %p3306_p6 = pnand %p2868_p5, %p4126_p1 }
  0x14   : > { %p2975_p13 = por %p2974_p12, %p2973_p11 }
  0x15   : > { %p3316_p7 = pneg %p3306_p6 }
  0x17   : > { %p2968_p9 = pnand %p2966_p8, %p3316_p7 }
  0x19   : > { %p2969_p10 = pneg %p2968_p9 }
  0x1b   : > { %p2976_p0 = pnand %p2975_p13, %p2969_p10 }
  0x1d   : > { %2979 = shalt.err (!%p2976_p0)
}
  0x1e   : > { %s3219_s16 = smov 128   ;;  %s3220_s17 = smov 8  }
  0x1f   : > { %s4134_s1 = sld [smem:[#allocation20_spill]]  ;;  %s2991_s20 = scalar_lea.vmem %s3310_s10, 2048 }
  0x20   : > { %p2992_p2 = scmp.ne.s32.totalorder %s3310_s10, %s2991_s20  ;;  %p2999_p9 = scmp.lt.s32.totalorder %s3310_s10, %s3310_s10 }
  0x21   : > { %p3000_p10 = scmp.lt.s32.totalorder %s2991_s20, %s2991_s20 }
  0x22   : > { %p2994_p5 = pnand %p2992_p2, %p3316_p7 }
  0x23   : > { %p3001_p11 = por %p3000_p10, %p2999_p9 }
  0x24   : > { %p2995_p8 = pneg %p2994_p5 }
  0x25   : > { %2871 = dma.hbm_to_vmem [thread:$0]  (!%p3306_p6), %s4134_s1, 14336, %s222_s29, [#allocation6], %s3219_s16, %s3219_s16, %s3220_s17  }
  0x26   : > { %p3002_p12 = pnand %p3001_p11, %p2995_p8 }
  0x28   : > { %3005 = shalt.err (!%p3002_p12)
}
  0x29   : > { %2877 = dma.hbm_to_vmem [thread:$0]  (!%p3306_p6), %s4121_s3, 2048, %s3310_s10, [#allocation9], %s3219_s16, %s3219_s16, %s3220_s17  }
  0x2a   : > { %s3017_s23 = scalar_lea.vmem %s3312_s13, 2048  ;;  %p3025_p5 = scmp.lt.s32.totalorder %s3312_s13, %s3312_s13 }
  0x2b   : > { %p3018_p13 = scmp.ne.s32.totalorder %s3312_s13, %s3017_s23  ;;  %p3026_p8 = scmp.lt.s32.totalorder %s3017_s23, %s3017_s23 }
  0x2d   : > { %p3020_p0 = pnand %p3018_p13, %p3316_p7  ;;  %p3027_p9 = por %p3026_p8, %p3025_p5 }
  0x2f   : > { %p3021_p2 = pneg %p3020_p0 }
  0x31   : > { %p3028_p10 = pnand %p3027_p9, %p3021_p2 }
  0x33   : > { %3031 = shalt.err (!%p3028_p10)
}
  0x34   : > { %2883 = dma.hbm_to_vmem [thread:$0]  (!%p3306_p6), %s4123_s5, 2048, %s3312_s13, [#allocation12], %s3219_s16, %s3219_s16, %s3220_s17  }
  0x35   : > { %s3221_s9 = smov [#allocation7]   ;;  %s3222_s12 = smov [#allocation10]  }
  0x36   : > { %s235_s10 = sshll.u32 %s3221_s9, 4  ;;  %s259_s15 = sshll.u32 %s3222_s12, 4  ;;  %s236_s10 = int_to_ptr.vmem [resolvable:$true] %s235_s10  ;;  %s260_s15 = int_to_ptr.vmem [resolvable:$true] %s259_s15 }
  0x37   : > { %s3043_s18 = scalar_lea.vmem %s236_s10, 16  ;;  %s3050_s19 = scalar_lea.vmem %s236_s10, 32 }
  0x38   : > { %p3044_p11 = scmp.ne.s32.totalorder %s236_s10, %s3043_s18  ;;  %p3051_p0 = scmp.lt.s32.totalorder %s236_s10, %s236_s10 }
  0x39   : > { %p3052_p2 = scmp.lt.s32.totalorder %s3050_s19, %s3043_s18 }
  0x3a   : > { %p3046_p12 = pnand %p3044_p11, %p3316_p7 }
  0x3b   : > { %p3053_p5 = por %p3052_p2, %p3051_p0 }
  0x3c   : > { %p3047_p13 = pneg %p3046_p12 }
  0x3e   : > { %p3054_p8 = pnand %p3053_p5, %p3047_p13 }
  0x40   : > { %3057 = shalt.err (!%p3054_p8)
}
  0x41   : > { %2874 = dma.hbm_to_vmem [thread:$0]  (!%p3306_p6), %s4120_s2, 16, %s236_s10, [#allocation6]  }
  0x42   : > { %s3069_s16 = scalar_lea.vmem %s260_s15, 16  ;;  %s3076_s17 = scalar_lea.vmem %s260_s15, 32 }
  0x43   : > { %p3070_p9 = scmp.ne.s32.totalorder %s260_s15, %s3069_s16  ;;  %p3077_p12 = scmp.lt.s32.totalorder %s260_s15, %s260_s15 }
  0x44   : > { %p3078_p4 = scmp.lt.s32.totalorder %s3076_s17, %s3069_s16 }
  0x45   : > { %p3072_p10 = pnand %p3070_p9, %p3316_p7 }
  0x46   : > { %p3079_p1 = por %p3078_p4, %p3077_p12 }
  0x47   : > { %p3073_p11 = pneg %p3072_p10 }
  0x49   : > { %p3080_p0 = pnand %p3079_p1, %p3073_p11 }
  0x4b   : > { %3083 = shalt.err (!%p3080_p0)
}
  0x4c   : > { %2880 = dma.hbm_to_vmem [thread:$0]  (!%p3306_p6), %s4122_s4, 16, %s260_s15, [#allocation9]  }
  0x4d   : > { %s3223_s23 = smov [#allocation13]  }
  0x4e   : > { %s283_s28 = sshll.u32 %s3223_s23, 4  ;;  %s284_s28 = int_to_ptr.vmem [resolvable:$true] %s283_s28 }
  0x4f   : > { %s3095_s29 = scalar_lea.vmem %s284_s28, 16  ;;  %s3102_s9 = scalar_lea.vmem %s284_s28, 32 }
  0x50   : > { %p3096_p13 = scmp.ne.s32.totalorder %s284_s28, %s3095_s29  ;;  %p3103_p8 = scmp.lt.s32.totalorder %s284_s28, %s284_s28 }
  0x51   : > { %p3104_p4 = scmp.lt.s32.totalorder %s3102_s9, %s3095_s29 }
  0x52   : > { %p3098_p2 = pnand %p3096_p13, %p3316_p7 }
  0x53   : > { %p3105_p1 = por %p3104_p4, %p3103_p8 }
  0x54   : > { %p3099_p5 = pneg %p3098_p2 }
  0x56   : > { %p3106_p9 = pnand %p3105_p1, %p3099_p5 }
  0x58   : > { %3109 = shalt.err (!%p3106_p9)
}
  0x59   : > { %2886 = dma.hbm_to_vmem [thread:$0]  (!%p3306_p6), %s4124_s6, 16, %s284_s28, [#allocation12]  }
  0x5a   : > { %s2360_s14 = sadd.s32 4294967294, %s3214_s27   ;;  %s3374_s11 = sadd.s32 1, %s3214_s27  }
  0x5b   : > { %s30_s15 = ssub.s32 %s3214_s27, %s3374_s11  ;;  %s33_s18 = sadd.s32 1, %s3210_s26 }
  0x5c   : > { %p31_p7 = scmp.eq.s32.totalorder %s30_s15, 0  ;;  %p40_p10 = scmp.ne.s32.totalorder %s3210_s26, %s3206_s25 }
  0x5d   : > { %p41_p11 = scmp.eq.s32.totalorder %s3214_s27, 0  ;;  %p46_p12 = scmp.ne.s32.totalorder %s3206_s25, %s3202_s24 }
  0x5e   : > { %s3385_s19 = scalar_select %p31_p7, %s3210_s26, %s33_s18  }
  0x5f   : > { %p42_p0 = por %p41_p11, %p40_p10  ;;  %p4135_p13 = scmp.eq.s32.totalorder %s3292_s30, 0 }
  0x60   : > { %p196_p6 = scmp.eq.s32.totalorder %s3292_s30, 1  ;;  %p202_p5 = scmp.eq.s32.totalorder %s2360_s14, 1 }
  0x61   : > { %p3389_p2 = por %p4135_p13, %p46_p12  ;;  %p2901_p8 = scmp.lt.s32.totalorder %s3214_s27, 2 }
  0x62   : > { %s294_s13 = sand.u32 1, %s3210_s26   ;;  %p3396_p4 = por %p196_p6, %p40_p10 }
  0x63   : > { %s4136_s20 = scalar_select %p3389_p2, 1, 0 }
  0x64   : > { %s4137_s16 = scalar_select %p3396_p4, 1, 0 }
  0x65   : > { %p3400_p1 = por %p202_p5, %p46_p12  ;;  %s2837_s21 = smul.u32 1792, %s294_s13 }
  0x66   : > { %s2838_s22 = smul.u32 28672, %s3214_s27  ;;  %p3405_p9 = pnand %p2901_p8, %p42_p0 }
  0x67   : > { %s4138_s17 = scalar_select %p3400_p1, 1, 0 }
  0x68   : > { %s3412_s9 = scalar_lea.hbm %s4118_s0, %s2838_s22  ;;  %s298_s10 = scalar_lea.vmem [#allocation2], %s2837_s21 }
  0x69   : > { %s306_s12 = sshll.u32 %s298_s10, 4  ;;  %s3416_s14 = scalar_lea.sflag [#allocation3], %s294_s13  ;;  %s3414_s12 = int_to_ptr.vmem [resolvable:$true] %s306_s12 }
  0x6a   : > { %s3110_s15 = scalar_lea.hbm %s3412_s9, 28672  ;;  %p3112_p10 = pneg %p3405_p9 }
  0x6b   : > { %p3111_p7 = scmp.ne.s32.totalorder %s3412_s9, %s3110_s15  ;;  %s3115_s22 = scalar_lea.hbm %s4118_s0, 57344 }
  0x6c   : > { %p3116_p0 = scmp.lt.s32.totalorder %s3412_s9, %s4118_s0  ;;  %p3117_p13 = scmp.lt.s32.totalorder %s3115_s22, %s3110_s15 }
  0x6d   : > { %p3113_p11 = pnand %p3112_p10, %p3111_p7 }
  0x6e   : > { %p3118_p6 = por %p3117_p13, %p3116_p0 }
  0x6f   : > { %p3114_p12 = pneg %p3113_p11 }
  0x71   : > { %p3119_p5 = pnand %p3118_p6, %p3114_p12 }
  0x73   : > { %3122 = shalt.err (!%p3119_p5)
}
  0x74   : > { %s3123_s13 = scalar_lea.vmem %s3414_s12, 28672  ;;  %s3224_s21 = smov [#allocation2]  }
  0x75   : > { %p3124_p8 = scmp.ne.s32.totalorder %s3414_s12, %s3123_s13  ;;  %s3128_s10 = sshll.u32 %s3224_s21, 4  ;;  %s3129_s10 = int_to_ptr.vmem [resolvable:$false] %s3128_s10 }
  0x76   : > { %s3130_s18 = scalar_lea.vmem %s3129_s10, 57344  ;;  %p3131_p11 = scmp.lt.s32.totalorder %s3414_s12, %s3129_s10 }
  0x77   : > { %p3126_p1 = pnand %p3124_p8, %p3112_p10  ;;  %p3132_p4 = scmp.lt.s32.totalorder %s3130_s18, %s3123_s13 }
  0x79   : > { %p3127_p7 = pneg %p3126_p1  ;;  %p3133_p2 = por %p3132_p4, %p3131_p11 }
  0x7b   : > { %p3134_p3 = pnand %p3133_p2, %p3127_p7 }
  0x7d   : > { %3137 = shalt.err (!%p3134_p3)
}
  0x7e   : > { %s3225_s1 = smov 896   ;;  %s3226_s15 = smov 56  }
  0x7f   : > { %2890 = dma.hbm_to_vmem [thread:$0]  (!%p3405_p9), %s3412_s9, 28672, %s3414_s12, %s3416_s14, %s3225_s1, %s3225_s1, %s3226_s15  }
  0x80   : > { %p4140_p10 = scmp.ne.s32.totalorder %s4131_s8, 0 }
  0x81   : > { %s3440_s28 = sand.u32 (!%p4140_p10), 1, %s3206_s25   ;;  %p4141_p3 = scmp.ne.s32.totalorder (!%p4140_p10), %s4136_s20, 0 }
  0x82   : > { %318 = sbr.rel (%p4140_p10) target bundleno = 1057 (0x421), region = 48  ;;  %s321_s29 = scalar_lea.sflag (!%p4140_p10), [#allocation3], %s3440_s28 }
  0x83   : > { %s2839_s22 = smul.u32 (!%p4140_p10), 1792, %s3440_s28 }
  0x85   : > { %s3444_s13 = scalar_lea.vmem (!%p4140_p10), [#allocation2], %s2839_s22 }
  0x87   : > { %3181 = dma.done.wait (%p4141_p3), %s321_s29, 28672  }
  0x88   : > { %3183 = vsyncadd (%p4141_p3), %s321_s29, 4294938624  ;;  %p4142_p2 = scmp.eq.s32.totalorder %s3292_s30, 0 }
  0x8a   : > { %3185 = dma.done.wait (%p4142_p2), [#allocation6], 14352   ;;  %p4143_p4 = pmov %p4142_p2 }
  0x8b   : > { %p4144_p1 = pmov %p4142_p2 }
  0x8c   : > { %3187 = vsyncadd (%p4143_p4), [#allocation6], 4294952944 }
  0x8d   : > { %3189 = dma.done.wait (%p4144_p1), [#allocation9], 2064   ;;  %p4145_p9 = pmov %p4144_p1 }
  0x8e   : > { %p4146_p12 = pmov %p4144_p1 }
  0x8f   : > { %3191 = vsyncadd (%p4145_p9), [#allocation9], 4294965232 }
  0x90   : > { %3193 = dma.done.wait (%p4146_p12), [#allocation12], 2064   ;;  %p4147_p0 = pmov %p4144_p1 }
  0x91   : > { %v3227_v0 = vmov 0.0   ;;  %v620_v1 = vld [vmem:[#allocation5 + $0x78] sm:$0xff]  ;;  %v619_v3 = vld [vmem:[#allocation5 + $0x70] sm:$0xff]  ;;  %v618_v5 = vld [vmem:[#allocation5 + $0x68] sm:$0xff]  ;;  %s2379_s8 = sshll.u32 %s3440_s28, 8  ;;  %s2388_s23 = sshll.u32 %s3292_s30, 12 }
  0x92   : > { %3195 = vsyncadd (%p4147_p0), [#allocation12], 4294965232  ;;  %724 = vmatprep.subr.mxu0 %v3227_v0  ;;  %949 = vmatprep.subr.mxu1 %v3227_v0  ;;  %v652_v2 = vld [vmem:[#allocation5 + $0x178] sm:$0xff]  ;;  %v651_v4 = vld [vmem:[#allocation5 + $0x170] sm:$0xff]  ;;  %s4003_s20 = scalar_lea.vmem [#allocation14], %s2379_s8  ;;  %s4070_s21 = scalar_lea.hbm %s4125_s7, %s2388_s23 }
  0x93   : > { %725 = vmatpush1.msra.mxu0 %v620_v1  ;;  %950 = vmatpush1.msra.mxu1 %v652_v2  ;;  %v650_v6 = vld [vmem:[#allocation5 + $0x168] sm:$0xff]  ;;  %v617_v7 = vld [vmem:[#allocation5 + $0x60] sm:$0xff]  ;;  %v616_v9 = vld [vmem:[#allocation5 + $0x58] sm:$0xff]  ;;  %s2230_s9 = sshll.u32 %s4003_s20, 4  ;;  %s2217_s30 = scalar_lea.sflag [#allocation4], %s3440_s28  ;;  %s4072_s9 = int_to_ptr.vmem [resolvable:$true] %s2230_s9 }
  0x94   : > { %726 = vmatprep.subr.mxu0 %v3227_v0  ;;  %951 = vmatprep.subr.mxu1 %v3227_v0  ;;  %v649_v8 = vld [vmem:[#allocation5 + $0x160] sm:$0xff]  ;;  %v648_v10 = vld [vmem:[#allocation5 + $0x158] sm:$0xff]  ;;  %v615_v11 = vld [vmem:[#allocation5 + $0x50] sm:$0xff]  ;;  %s3138_s10 = scalar_lea.vmem %s4072_s9, 4096  ;;  %p4148_p6 = scmp.ne.s32.totalorder %s4137_s16, 0 }
  0x95   : > { %727 = vmatpush1.msra.mxu0 %v619_v3  ;;  %952 = vmatpush1.msra.mxu1 %v651_v4  ;;  %v647_v12 = vld [vmem:[#allocation5 + $0x150] sm:$0xff]  ;;  %v614_v13 = vld [vmem:[#allocation5 + $0x48] sm:$0xff]  ;;  %v613_v15 = vld [vmem:[#allocation5 + $0x40] sm:$0xff]  ;;  %p3139_p13 = scmp.ne.s32.totalorder %s4072_s9, %s3138_s10  ;;  %s3228_s18 = smov [#allocation14]  }
  0x96   : > { %728 = vmatprep.subr.mxu0 %v3227_v0  ;;  %953 = vmatprep.subr.mxu1 %v3227_v0  ;;  %v646_v14 = vld [vmem:[#allocation5 + $0x148] sm:$0xff]  ;;  %v645_v16 = vld [vmem:[#allocation5 + $0x140] sm:$0xff]  ;;  %v612_v17 = vld [vmem:[#allocation5 + $0x38] sm:$0xff]  ;;  %s3142_s1 = sshll.u32 %s3228_s18, 4  ;;  %s3143_s1 = int_to_ptr.vmem [resolvable:$false] %s3142_s1 }
  0x97   : > { %729 = vmatpush1.msra.mxu0 %v618_v5  ;;  %954 = vmatpush1.msra.mxu1 %v650_v6  ;;  %v644_v18 = vld [vmem:[#allocation5 + $0x138] sm:$0xff]  ;;  %v611_v19 = vld [vmem:[#allocation5 + $0x30] sm:$0xff]  ;;  %v610_v21 = vld [vmem:[#allocation5 + $0x28] sm:$0xff]  ;;  %p3140_p5 = pnand %p3139_p13, %p4148_p6  ;;  %s3144_s15 = scalar_lea.vmem %s3143_s1, 8192 }
  0x98   : > { %730 = vmatprep.subr.mxu0 %v3227_v0  ;;  %955 = vmatprep.subr.mxu1 %v3227_v0  ;;  %v643_v20 = vld [vmem:[#allocation5 + $0x130] sm:$0xff]  ;;  %v642_v22 = vld [vmem:[#allocation5 + $0x128] sm:$0xff]  ;;  %v609_v23 = vld [vmem:[#allocation5 + $0x20] sm:$0xff]  ;;  %p3145_p7 = scmp.lt.s32.totalorder %s4072_s9, %s3143_s1  ;;  %p3146_p11 = scmp.lt.s32.totalorder %s3144_s15, %s3138_s10 }
  0x99   : > { %731 = vmatpush1.msra.mxu0 %v617_v7  ;;  %956 = vmatpush1.msra.mxu1 %v649_v8  ;;  %v641_v24 = vld [vmem:[#allocation5 + $0x120] sm:$0xff]  ;;  %v608_v25 = vld [vmem:[#allocation5 + $0x18] sm:$0xff]  ;;  %v607_v27 = vld [vmem:[#allocation5 + $0x10] sm:$0xff]  ;;  %p3141_p8 = pneg %p3140_p5 }
  0x9a   : > { %732 = vmatprep.subr.mxu0 %v3227_v0  ;;  %957 = vmatprep.subr.mxu1 %v3227_v0  ;;  %v640_v26 = vld [vmem:[#allocation5 + $0x118] sm:$0xff]  ;;  %v639_v28 = vld [vmem:[#allocation5 + $0x110] sm:$0xff]  ;;  %v606_v29 = vld [vmem:[#allocation5 + $0x8] sm:$0xff]  ;;  %p3147_p10 = por %p3146_p11, %p3145_p7 }
  0x9b   : > { %733 = vmatpush1.msra.mxu0 %v616_v9  ;;  %958 = vmatpush1.msra.mxu1 %v648_v10  ;;  %v638_v30 = vld [vmem:[#allocation5 + $0x108] sm:$0xff]  ;;  %v605_v31 = vld [vmem:[#allocation5] sm:$0xff]  ;;  %v636_v33 = vld [vmem:[#allocation5 + $0xf8] sm:$0xff] }
  0x9c   : > { %734 = vmatprep.subr.mxu0 %v3227_v0  ;;  %959 = vmatprep.subr.mxu1 %v3227_v0  ;;  %v637_v32 = vld [vmem:[#allocation5 + $0x100] sm:$0xff]  ;;  %v668_v34 = vld [vmem:[#allocation5 + $0x1f8] sm:$0xff]  ;;  %v635_v35 = vld [vmem:[#allocation5 + $0xf0] sm:$0xff]  ;;  %p3148_p3 = pnand %p3147_p10, %p3141_p8 }
  0x9d   : > { %735 = vmatpush1.msra.mxu0 %v615_v11  ;;  %960 = vmatpush1.msra.mxu1 %v647_v12  ;;  %v667_v36 = vld [vmem:[#allocation5 + $0x1f0] sm:$0xff]  ;;  %v634_v37 = vld [vmem:[#allocation5 + $0xe8] sm:$0xff]  ;;  %v633_v39 = vld [vmem:[#allocation5 + $0xe0] sm:$0xff] }
  0x9e   : > { %736 = vmatprep.subr.mxu0 %v3227_v0  ;;  %961 = vmatprep.subr.mxu1 %v3227_v0  ;;  %v666_v38 = vld [vmem:[#allocation5 + $0x1e8] sm:$0xff]  ;;  %v665_v40 = vld [vmem:[#allocation5 + $0x1e0] sm:$0xff]  ;;  %v632_v41 = vld [vmem:[#allocation5 + $0xd8] sm:$0xff] }
  0x9f   : > { %737 = vmatpush1.msra.mxu0 %v614_v13  ;;  %962 = vmatpush1.msra.mxu1 %v646_v14  ;;  %v664_v42 = vld [vmem:[#allocation5 + $0x1d8] sm:$0xff]  ;;  %v631_v43 = vld [vmem:[#allocation5 + $0xd0] sm:$0xff]  ;;  %v630_v45 = vld [vmem:[#allocation5 + $0xc8] sm:$0xff] }
  0xa0   : > { %738 = vmatprep.subr.mxu0 %v3227_v0  ;;  %963 = vmatprep.subr.mxu1 %v3227_v0  ;;  %v663_v44 = vld [vmem:[#allocation5 + $0x1d0] sm:$0xff]  ;;  %v662_v46 = vld [vmem:[#allocation5 + $0x1c8] sm:$0xff]  ;;  %v629_v47 = vld [vmem:[#allocation5 + $0xc0] sm:$0xff] }
  0xa1   : > { %739 = vmatpush1.msra.mxu0 %v613_v15  ;;  %964 = vmatpush1.msra.mxu1 %v645_v16  ;;  %v661_v48 = vld [vmem:[#allocation5 + $0x1c0] sm:$0xff]  ;;  %v628_v49 = vld [vmem:[#allocation5 + $0xb8] sm:$0xff]  ;;  %v627_v51 = vld [vmem:[#allocation5 + $0xb0] sm:$0xff] }
  0xa2   : > { %740 = vmatprep.subr.mxu0 %v3227_v0  ;;  %965 = vmatprep.subr.mxu1 %v3227_v0  ;;  %v660_v50 = vld [vmem:[#allocation5 + $0x1b8] sm:$0xff]  ;;  %v659_v52 = vld [vmem:[#allocation5 + $0x1b0] sm:$0xff]  ;;  %v626_v53 = vld [vmem:[#allocation5 + $0xa8] sm:$0xff] }
  0xa3   : > { %741 = vmatpush1.msra.mxu0 %v612_v17  ;;  %966 = vmatpush1.msra.mxu1 %v644_v18  ;;  %v658_v54 = vld [vmem:[#allocation5 + $0x1a8] sm:$0xff]  ;;  %v625_v55 = vld [vmem:[#allocation5 + $0xa0] sm:$0xff]  ;;  %v624_v57 = vld [vmem:[#allocation5 + $0x98] sm:$0xff] }
  0xa4   : > { %742 = vmatprep.subr.mxu0 %v3227_v0  ;;  %967 = vmatprep.subr.mxu1 %v3227_v0  ;;  %v657_v56 = vld [vmem:[#allocation5 + $0x1a0] sm:$0xff]  ;;  %v656_v58 = vld [vmem:[#allocation5 + $0x198] sm:$0xff]  ;;  %v623_v59 = vld [vmem:[#allocation5 + $0x90] sm:$0xff] }
  0xa5   : > { %743 = vmatpush1.msra.mxu0 %v611_v19  ;;  %968 = vmatpush1.msra.mxu1 %v643_v20  ;;  %v655_v60 = vld [vmem:[#allocation5 + $0x190] sm:$0xff]  ;;  %v622_v61 = vld [vmem:[#allocation5 + $0x88] sm:$0xff]  ;;  %v621_v63 = vld [vmem:[#allocation5 + $0x80] sm:$0xff] }
  0xa6   : > { %744 = vmatprep.subr.mxu0 %v3227_v0  ;;  %969 = vmatprep.subr.mxu1 %v3227_v0  ;;  %v654_v62 = vld [vmem:[#allocation5 + $0x188] sm:$0xff]  ;;  %v653_v2 = vld [vmem:[#allocation5 + $0x180] sm:$0xff]  ;;  %v384_v3 = vld [vmem:[%s3444_s13 + $0x18] sm:$0xff] }
  0xa7   : > { %745 = vmatpush1.msra.mxu0 %v610_v21  ;;  %970 = vmatpush1.msra.mxu1 %v642_v22  ;;  %v382_v1 = vld [vmem:[%s3444_s13 + $0x8] sm:$0xff]  ;;  %v381_v4 = vld [vmem:[%s3444_s13] sm:$0xff]  ;;  %v383_v5 = vld [vmem:[%s3444_s13 + $0x10] sm:$0xff] }
  0xa8   : > { %746 = vmatprep.subr.mxu0 %v3227_v0  ;;  %971 = vmatprep.subr.mxu1 %v3227_v0  ;;  %v389_v6 = vld [vmem:[%s3444_s13 + $0x40] sm:$0xff]  ;;  %v684_v7 = vld [vmem:[#allocation5 + $0x278] sm:$0xff]  ;;  %v391_v8 = vld [vmem:[%s3444_s13 + $0x50] sm:$0xff] }
  0xa9   : > { %747 = vmatpush1.msra.mxu0 %v609_v23  ;;  %972 = vmatpush1.msra.mxu1 %v641_v24  ;;  %v388_v9 = vld [vmem:[%s3444_s13 + $0x38] sm:$0xff]  ;;  %v390_v10 = vld [vmem:[%s3444_s13 + $0x48] sm:$0xff]  ;;  %v683_v11 = vld [vmem:[#allocation5 + $0x270] sm:$0xff] }
  0xaa   : > { %748 = vmatprep.subr.mxu0 %v3227_v0  ;;  %973 = vmatprep.subr.mxu1 %v3227_v0  ;;  %v396_v12 = vld [vmem:[%s3444_s13 + $0x78] sm:$0xff]  ;;  %v398_v13 = vld [vmem:[%s3444_s13 + $0x88] sm:$0xff]  ;;  %v395_v15 = vld [vmem:[%s3444_s13 + $0x70] sm:$0xff] }
  0xab   : > { %749 = vmatpush1.msra.mxu0 %v608_v25  ;;  %974 = vmatpush1.msra.mxu1 %v640_v26  ;;  %v682_v14 = vld [vmem:[#allocation5 + $0x268] sm:$0xff]  ;;  %v397_v16 = vld [vmem:[%s3444_s13 + $0x80] sm:$0xff]  ;;  %v403_v17 = vld [vmem:[%s3444_s13 + $0xb0] sm:$0xff] }
  0xac   : > { %750 = vmatprep.subr.mxu0 %v3227_v0  ;;  %975 = vmatprep.subr.mxu1 %v3227_v0  ;;  %v405_v18 = vld [vmem:[%s3444_s13 + $0xc0] sm:$0xff]  ;;  %v402_v20 = vld [vmem:[%s3444_s13 + $0xa8] sm:$0xff]  ;;  %v404_v21 = vld [vmem:[%s3444_s13 + $0xb8] sm:$0xff] }
  0xad   : > { %751 = vmatpush1.msra.mxu0 %v607_v27  ;;  %976 = vmatpush1.msra.mxu1 %v639_v28  ;;  %v681_v19 = vld [vmem:[#allocation5 + $0x260] sm:$0xff]  ;;  %v410_v22 = vld [vmem:[%s3444_s13 + $0xe8] sm:$0xff]  ;;  %v412_v23 = vld [vmem:[%s3444_s13 + $0xf8] sm:$0xff] }
  0xae   : > { %752 = vmatprep.subr.mxu0 %v3227_v0  ;;  %977 = vmatprep.subr.mxu1 %v3227_v0  ;;  %v680_v24 = vld [vmem:[#allocation5 + $0x258] sm:$0xff]  ;;  %v409_v25 = vld [vmem:[%s3444_s13 + $0xe0] sm:$0xff]  ;;  %v411_v26 = vld [vmem:[%s3444_s13 + $0xf0] sm:$0xff] }
  0xaf   : > { %753 = vmatpush1.msra.mxu0 %v606_v29  ;;  %978 = vmatpush1.msra.mxu1 %v638_v30  ;;  %v417_v27 = vld [vmem:[%s3444_s13 + $0x120] sm:$0xff]  ;;  %v419_v28 = vld [vmem:[%s3444_s13 + $0x130] sm:$0xff]  ;;  %v416_v30 = vld [vmem:[%s3444_s13 + $0x118] sm:$0xff] }
  0xb0   : > { %754 = vmatprep.subr.mxu0 %v3227_v0  ;;  %979 = vmatprep.subr.mxu1 %v3227_v0  ;;  %v679_v29 = vld [vmem:[#allocation5 + $0x250] sm:$0xff] }
  0xb1   : > { %755 = vmatpush1.msra.mxu0 %v605_v31  ;;  %980 = vmatpush1.msra.mxu1 %v637_v32  ;;  %v418_v31 = vld [vmem:[%s3444_s13 + $0x128] sm:$0xff]  ;;  %v424_v32 = vld [vmem:[%s3444_s13 + $0x158] sm:$0xff] }
  0xb2   : > { %756 = vmatprep.subr.mxu0 %v3227_v0  ;;  %981 = vmatprep.subr.mxu1 %v3227_v0 }
  0xb3   : > { %757 = vmatpush2.msra.mxu0 %v636_v33  ;;  %982 = vmatpush2.msra.mxu1 %v668_v34  ;;  %v426_v33 = vld [vmem:[%s3444_s13 + $0x168] sm:$0xff] }
  0xb4   : > { %758 = vmatprep.subr.mxu0 %v3227_v0  ;;  %983 = vmatprep.subr.mxu1 %v3227_v0  ;;  %v678_v34 = vld [vmem:[#allocation5 + $0x248] sm:$0xff] }
  0xb5   : > { %759 = vmatpush2.msra.mxu0 %v635_v35  ;;  %984 = vmatpush2.msra.mxu1 %v667_v36  ;;  %v423_v35 = vld [vmem:[%s3444_s13 + $0x150] sm:$0xff]  ;;  %v425_v36 = vld [vmem:[%s3444_s13 + $0x160] sm:$0xff] }
  0xb6   : > { %760 = vmatprep.subr.mxu0 %v3227_v0  ;;  %985 = vmatprep.subr.mxu1 %v3227_v0 }
  0xb7   : > { %761 = vmatpush2.msra.mxu0 %v634_v37  ;;  %986 = vmatpush2.msra.mxu1 %v666_v38  ;;  %v431_v37 = vld [vmem:[%s3444_s13 + $0x190] sm:$0xff]  ;;  %v433_v38 = vld [vmem:[%s3444_s13 + $0x1a0] sm:$0xff] }
  0xb8   : > { %762 = vmatprep.subr.mxu0 %v3227_v0  ;;  %987 = vmatprep.subr.mxu1 %v3227_v0 }
  0xb9   : > { %763 = vmatpush2.msra.mxu0 %v633_v39  ;;  %988 = vmatpush2.msra.mxu1 %v665_v40  ;;  %v677_v39 = vld [vmem:[#allocation5 + $0x240] sm:$0xff]  ;;  %v430_v40 = vld [vmem:[%s3444_s13 + $0x188] sm:$0xff] }
  0xba   : > { %764 = vmatprep.subr.mxu0 %v3227_v0  ;;  %989 = vmatprep.subr.mxu1 %v3227_v0 }
  0xbb   : > { %765 = vmatpush2.msra.mxu0 %v632_v41  ;;  %990 = vmatpush2.msra.mxu1 %v664_v42  ;;  %v432_v41 = vld [vmem:[%s3444_s13 + $0x198] sm:$0xff]  ;;  %v438_v42 = vld [vmem:[%s3444_s13 + $0x1c8] sm:$0xff] }
  0xbc   : > { %766 = vmatprep.subr.mxu0 %v3227_v0  ;;  %991 = vmatprep.subr.mxu1 %v3227_v0 }
  0xbd   : > { %767 = vmatpush2.msra.mxu0 %v631_v43  ;;  %992 = vmatpush2.msra.mxu1 %v663_v44  ;;  %v440_v43 = vld [vmem:[%s3444_s13 + $0x1d8] sm:$0xff] }
  0xbe   : > { %768 = vmatprep.subr.mxu0 %v3227_v0  ;;  %993 = vmatprep.subr.mxu1 %v3227_v0  ;;  %v676_v44 = vld [vmem:[#allocation5 + $0x238] sm:$0xff] }
  0xbf   : > { %769 = vmatpush2.msra.mxu0 %v630_v45  ;;  %994 = vmatpush2.msra.mxu1 %v662_v46  ;;  %v437_v45 = vld [vmem:[%s3444_s13 + $0x1c0] sm:$0xff]  ;;  %v439_v46 = vld [vmem:[%s3444_s13 + $0x1d0] sm:$0xff] }
  0xc0   : > { %770 = vmatprep.subr.mxu0 %v3227_v0  ;;  %995 = vmatprep.subr.mxu1 %v3227_v0 }
  0xc1   : > { %771 = vmatpush2.msra.mxu0 %v629_v47  ;;  %996 = vmatpush2.msra.mxu1 %v661_v48  ;;  %v445_v47 = vld [vmem:[%s3444_s13 + $0x200] sm:$0xff]  ;;  %v447_v48 = vld [vmem:[%s3444_s13 + $0x210] sm:$0xff] }
  0xc2   : > { %772 = vmatprep.subr.mxu0 %v3227_v0  ;;  %997 = vmatprep.subr.mxu1 %v3227_v0 }
  0xc3   : > { %773 = vmatpush2.msra.mxu0 %v628_v49  ;;  %998 = vmatpush2.msra.mxu1 %v660_v50  ;;  %v675_v49 = vld [vmem:[#allocation5 + $0x230] sm:$0xff]  ;;  %v444_v50 = vld [vmem:[%s3444_s13 + $0x1f8] sm:$0xff] }
  0xc4   : > { %774 = vmatprep.subr.mxu0 %v3227_v0  ;;  %999 = vmatprep.subr.mxu1 %v3227_v0 }
  0xc5   : > { %775 = vmatpush2.msra.mxu0 %v627_v51  ;;  %1000 = vmatpush2.msra.mxu1 %v659_v52  ;;  %v446_v51 = vld [vmem:[%s3444_s13 + $0x208] sm:$0xff]  ;;  %v452_v52 = vld [vmem:[%s3444_s13 + $0x238] sm:$0xff] }
  0xc6   : > { %776 = vmatprep.subr.mxu0 %v3227_v0  ;;  %1001 = vmatprep.subr.mxu1 %v3227_v0 }
  0xc7   : > { %777 = vmatpush2.msra.mxu0 %v626_v53  ;;  %1002 = vmatpush2.msra.mxu1 %v658_v54  ;;  %v454_v53 = vld [vmem:[%s3444_s13 + $0x248] sm:$0xff] }
  0xc8   : > { %778 = vmatprep.subr.mxu0 %v3227_v0  ;;  %1003 = vmatprep.subr.mxu1 %v3227_v0  ;;  %v674_v54 = vld [vmem:[#allocation5 + $0x228] sm:$0xff] }
  0xc9   : > { %779 = vmatpush2.msra.mxu0 %v625_v55  ;;  %1004 = vmatpush2.msra.mxu1 %v657_v56  ;;  %v451_v55 = vld [vmem:[%s3444_s13 + $0x230] sm:$0xff]  ;;  %v453_v56 = vld [vmem:[%s3444_s13 + $0x240] sm:$0xff] }
  0xca   : > { %780 = vmatprep.subr.mxu0 %v3227_v0  ;;  %1005 = vmatprep.subr.mxu1 %v3227_v0 }
  0xcb   : > { %781 = vmatpush2.msra.mxu0 %v624_v57  ;;  %1006 = vmatpush2.msra.mxu1 %v656_v58  ;;  %v459_v57 = vld [vmem:[%s3444_s13 + $0x270] sm:$0xff]  ;;  %v461_v58 = vld [vmem:[%s3444_s13 + $0x280] sm:$0xff] }
  0xcc   : > { %782 = vmatprep.subr.mxu0 %v3227_v0  ;;  %1007 = vmatprep.subr.mxu1 %v3227_v0 }
  0xcd   : > { %783 = vmatpush2.msra.mxu0 %v623_v59  ;;  %1008 = vmatpush2.msra.mxu1 %v655_v60  ;;  %v673_v59 = vld [vmem:[#allocation5 + $0x220] sm:$0xff]  ;;  %v458_v60 = vld [vmem:[%s3444_s13 + $0x268] sm:$0xff] }
  0xce   : > { %784 = vmatprep.subr.mxu0 %v3227_v0  ;;  %1009 = vmatprep.subr.mxu1 %v3227_v0 }
  0xcf   : > { %785 = vmatpush2.msra.mxu0 %v622_v61  ;;  %1010 = vmatpush2.msra.mxu1 %v654_v62  ;;  %v460_v61 = vld [vmem:[%s3444_s13 + $0x278] sm:$0xff]  ;;  %v466_v62 = vld [vmem:[%s3444_s13 + $0x2a8] sm:$0xff] }
  0xd0   : > { %786 = vmatprep.subr.mxu0 %v3227_v0  ;;  %1011 = vmatprep.subr.mxu1 %v3227_v0 }
  0xd1   : > { %787 = vmatpush2.msra.mxu0 %v621_v63  ;;  %788 = vmatprep.mubr.f32.mxu0 %v382_v1  ;;  %v468_v63 = vld [vmem:[%s3444_s13 + $0x2b8] sm:$0xff] }
  0xd2   : > { %1012 = vmatpush2.msra.mxu1 %v653_v2  ;;  %1013 = vmatprep.mubr.f32.mxu1 %v384_v3  ;;  %v672_v1 = vld [vmem:[#allocation5 + $0x218] sm:$0xff]  ;;  %v465_v2 = vld [vmem:[%s3444_s13 + $0x2a0] sm:$0xff]  ;;  %v467_v3 = vld [vmem:[%s3444_s13 + $0x2b0] sm:$0xff] }
  0xd3   : > { %789 = vmatmul.mubr.f32.vlgmr.msra.gmra.mxu0 %v381_v4  ;;  %1014 = vmatmul.mubr.f32.vlgmr.msra.gmra.mxu1 %v383_v5  ;;  %v473_v4 = vld [vmem:[%s3444_s13 + $0x2e0] sm:$0xff]  ;;  %v475_v5 = vld [vmem:[%s3444_s13 + $0x2f0] sm:$0xff] }
  0xd4   : > { %1174 = vmatprep.subr.mxu0 %v3227_v0  ;;  %793 = vmatprep.mubr.f32.mxu0 %v389_v6  ;;  %v671_v6 = vld [vmem:[#allocation5 + $0x210] sm:$0xff] }
  0xd5   : > { %1175 = vmatpush1.msra.mxu0 %v684_v7  ;;  %1018 = vmatprep.mubr.f32.mxu1 %v391_v8  ;;  %v474_v8 = vld [vmem:[%s3444_s13 + $0x2e8] sm:$0xff] }
  0xd6   : > { %1176 = vmatprep.subr.mxu0 %v3227_v0  ;;  %2773 = vmatprep.subr.mxu1 %v3227_v0 }
  0xd7   : > { %794 = vmatmul.mubr.f32.gmra.mxu0 %v388_v9  ;;  %1019 = vmatmul.mubr.f32.gmra.mxu1 %v390_v10  ;;  %v480_v9 = vld [vmem:[%s3444_s13 + $0x318] sm:$0xff]  ;;  %v482_v10 = vld [vmem:[%s3444_s13 + $0x328] sm:$0xff] }
  0xd8   : > { %1177 = vmatpush1.msra.mxu0 %v683_v11  ;;  %798 = vmatprep.mubr.f32.mxu0 %v396_v12  ;;  %v479_v12 = vld [vmem:[%s3444_s13 + $0x310] sm:$0xff] }
  0xd9   : > { %1023 = vmatprep.mubr.f32.mxu1 %v398_v13  ;;  %1178 = vmatprep.subr.mxu0 %v3227_v0  ;;  %v481_v13 = vld [vmem:[%s3444_s13 + $0x320] sm:$0xff] }
  0xda   : > { %1179 = vmatpush1.msra.mxu0 %v682_v14  ;;  %2805 = vmatpush1.msra.mxu1 %v684_v7  ;;  %v472_v7 = vld [vmem:[%s3444_s13 + $0x2d8] sm:$0xff] }
  0xdb   : > { %799 = vmatmul.mubr.f32.gmra.mxu0 %v395_v15  ;;  %1024 = vmatmul.mubr.f32.gmra.mxu1 %v397_v16  ;;  %v489_v15 = vld [vmem:[%s3444_s13 + $0x360] sm:$0xff] }
  0xdc   : > { %803 = vmatprep.mubr.f32.mxu0 %v403_v17  ;;  %1028 = vmatprep.mubr.f32.mxu1 %v405_v18  ;;  %v669_v16 = vld [vmem:[#allocation5 + $0x200] sm:$0xff]  ;;  %v486_v17 = vld [vmem:[%s3444_s13 + $0x348] sm:$0xff]  ;;  %v488_v18 = vld [vmem:[%s3444_s13 + $0x358] sm:$0xff] }
  0xdd   : > { %1180 = vmatprep.subr.mxu0 %v3227_v0  ;;  %2774 = vmatprep.subr.mxu1 %v3227_v0 }
  0xde   : > { %1181 = vmatpush1.msra.mxu0 %v681_v19  ;;  %2806 = vmatpush1.msra.mxu1 %v683_v11  ;;  %v670_v11 = vld [vmem:[#allocation5 + $0x208] sm:$0xff] }
  0xdf   : > { %804 = vmatmul.mubr.f32.gmra.mxu0 %v402_v20  ;;  %1029 = vmatmul.mubr.f32.gmra.mxu1 %v404_v21  ;;  %v496_v20 = vld [vmem:[%s3444_s13 + $0x398] sm:$0xff] }
  0xe0   : > { %808 = vmatprep.mubr.f32.mxu0 %v410_v22  ;;  %1033 = vmatprep.mubr.f32.mxu1 %v412_v23  ;;  %v700_v21 = vld [vmem:[#allocation5 + $0x2f8] sm:$0xff]  ;;  %v493_v22 = vld [vmem:[%s3444_s13 + $0x380] sm:$0xff]  ;;  %v495_v23 = vld [vmem:[%s3444_s13 + $0x390] sm:$0xff] }
  0xe1   : > { %1182 = vmatprep.subr.mxu0 %v3227_v0  ;;  %2775 = vmatprep.subr.mxu1 %v3227_v0 }
  0xe2   : > { %1183 = vmatpush1.msra.mxu0 %v680_v24  ;;  %2807 = vmatpush1.msra.mxu1 %v682_v14  ;;  %v487_v14 = vld [vmem:[%s3444_s13 + $0x350] sm:$0xff] }
  0xe3   : > { %809 = vmatmul.mubr.f32.gmra.mxu0 %v409_v25  ;;  %1034 = vmatmul.mubr.f32.gmra.mxu1 %v411_v26  ;;  %v503_v25 = vld [vmem:[%s3444_s13 + $0x3d0] sm:$0xff] }
  0xe4   : > { %813 = vmatprep.mubr.f32.mxu0 %v417_v27  ;;  %1038 = vmatprep.mubr.f32.mxu1 %v419_v28  ;;  %v699_v26 = vld [vmem:[#allocation5 + $0x2f0] sm:$0xff]  ;;  %v500_v27 = vld [vmem:[%s3444_s13 + $0x3b8] sm:$0xff]  ;;  %v502_v28 = vld [vmem:[%s3444_s13 + $0x3c8] sm:$0xff] }
  0xe5   : > { %1184 = vmatprep.subr.mxu0 %v3227_v0  ;;  %2776 = vmatprep.subr.mxu1 %v3227_v0 }
  0xe6   : > { %1185 = vmatpush1.msra.mxu0 %v679_v29  ;;  %2808 = vmatpush1.msra.mxu1 %v681_v19  ;;  %v494_v19 = vld [vmem:[%s3444_s13 + $0x388] sm:$0xff] }
  0xe7   : > { %814 = vmatmul.mubr.f32.gmra.mxu0 %v416_v30  ;;  %1039 = vmatmul.mubr.f32.gmra.mxu1 %v418_v31  ;;  %v510_v30 = vld [vmem:[%s3444_s13 + $0x408] sm:$0xff] }
  0xe8   : > { %818 = vmatprep.mubr.f32.mxu0 %v424_v32  ;;  %1043 = vmatprep.mubr.f32.mxu1 %v426_v33  ;;  %v698_v31 = vld [vmem:[#allocation5 + $0x2e8] sm:$0xff]  ;;  %v507_v32 = vld [vmem:[%s3444_s13 + $0x3f0] sm:$0xff]  ;;  %v509_v33 = vld [vmem:[%s3444_s13 + $0x400] sm:$0xff] }
  0xe9   : > { %1186 = vmatprep.subr.mxu0 %v3227_v0  ;;  %2777 = vmatprep.subr.mxu1 %v3227_v0 }
  0xea   : > { %1187 = vmatpush1.msra.mxu0 %v678_v34  ;;  %2809 = vmatpush1.msra.mxu1 %v680_v24  ;;  %v501_v24 = vld [vmem:[%s3444_s13 + $0x3c0] sm:$0xff] }
  0xeb   : > { %819 = vmatmul.mubr.f32.gmra.mxu0 %v423_v35  ;;  %1044 = vmatmul.mubr.f32.gmra.mxu1 %v425_v36  ;;  %v517_v35 = vld [vmem:[%s3444_s13 + $0x440] sm:$0xff] }
  0xec   : > { %823 = vmatprep.mubr.f32.mxu0 %v431_v37  ;;  %1048 = vmatprep.mubr.f32.mxu1 %v433_v38  ;;  %v697_v36 = vld [vmem:[#allocation5 + $0x2e0] sm:$0xff]  ;;  %v514_v37 = vld [vmem:[%s3444_s13 + $0x428] sm:$0xff]  ;;  %v516_v38 = vld [vmem:[%s3444_s13 + $0x438] sm:$0xff] }
  0xed   : > { %1188 = vmatprep.subr.mxu0 %v3227_v0  ;;  %2778 = vmatprep.subr.mxu1 %v3227_v0 }
  0xee   : > { %1189 = vmatpush1.msra.mxu0 %v677_v39  ;;  %2810 = vmatpush1.msra.mxu1 %v679_v29  ;;  %v508_v29 = vld [vmem:[%s3444_s13 + $0x3f8] sm:$0xff] }
  0xef   : > { %824 = vmatmul.mubr.f32.gmra.mxu0 %v430_v40  ;;  %1049 = vmatmul.mubr.f32.gmra.mxu1 %v432_v41  ;;  %v524_v40 = vld [vmem:[%s3444_s13 + $0x478] sm:$0xff] }
  0xf0   : > { %828 = vmatprep.mubr.f32.mxu0 %v438_v42  ;;  %1053 = vmatprep.mubr.f32.mxu1 %v440_v43  ;;  %v696_v41 = vld [vmem:[#allocation5 + $0x2d8] sm:$0xff]  ;;  %v521_v42 = vld [vmem:[%s3444_s13 + $0x460] sm:$0xff]  ;;  %v523_v43 = vld [vmem:[%s3444_s13 + $0x470] sm:$0xff] }
  0xf1   : > { %1190 = vmatprep.subr.mxu0 %v3227_v0  ;;  %2779 = vmatprep.subr.mxu1 %v3227_v0 }
  0xf2   : > { %1191 = vmatpush1.msra.mxu0 %v676_v44  ;;  %2811 = vmatpush1.msra.mxu1 %v678_v34  ;;  %v515_v34 = vld [vmem:[%s3444_s13 + $0x430] sm:$0xff] }
  0xf3   : > { %829 = vmatmul.mubr.f32.gmra.mxu0 %v437_v45  ;;  %1054 = vmatmul.mubr.f32.gmra.mxu1 %v439_v46  ;;  %v531_v45 = vld [vmem:[%s3444_s13 + $0x4b0] sm:$0xff] }
  0xf4   : > { %833 = vmatprep.mubr.f32.mxu0 %v445_v47  ;;  %1058 = vmatprep.mubr.f32.mxu1 %v447_v48  ;;  %v695_v46 = vld [vmem:[#allocation5 + $0x2d0] sm:$0xff]  ;;  %v528_v47 = vld [vmem:[%s3444_s13 + $0x498] sm:$0xff]  ;;  %v530_v48 = vld [vmem:[%s3444_s13 + $0x4a8] sm:$0xff] }
  0xf5   : > { %1192 = vmatprep.subr.mxu0 %v3227_v0  ;;  %2780 = vmatprep.subr.mxu1 %v3227_v0 }
  0xf6   : > { %1193 = vmatpush1.msra.mxu0 %v675_v49  ;;  %2812 = vmatpush1.msra.mxu1 %v677_v39  ;;  %v522_v39 = vld [vmem:[%s3444_s13 + $0x468] sm:$0xff] }
  0xf7   : > { %834 = vmatmul.mubr.f32.gmra.mxu0 %v444_v50  ;;  %1059 = vmatmul.mubr.f32.gmra.mxu1 %v446_v51  ;;  %v538_v50 = vld [vmem:[%s3444_s13 + $0x4e8] sm:$0xff] }
  0xf8   : > { %838 = vmatprep.mubr.f32.mxu0 %v452_v52  ;;  %1063 = vmatprep.mubr.f32.mxu1 %v454_v53  ;;  %v694_v51 = vld [vmem:[#allocation5 + $0x2c8] sm:$0xff]  ;;  %v535_v52 = vld [vmem:[%s3444_s13 + $0x4d0] sm:$0xff]  ;;  %v537_v53 = vld [vmem:[%s3444_s13 + $0x4e0] sm:$0xff] }
  0xf9   : > { %1194 = vmatprep.subr.mxu0 %v3227_v0  ;;  %2781 = vmatprep.subr.mxu1 %v3227_v0 }
  0xfa   : > { %1195 = vmatpush1.msra.mxu0 %v674_v54  ;;  %2813 = vmatpush1.msra.mxu1 %v676_v44  ;;  %v529_v44 = vld [vmem:[%s3444_s13 + $0x4a0] sm:$0xff] }
  0xfb   : > { %839 = vmatmul.mubr.f32.gmra.mxu0 %v451_v55  ;;  %1064 = vmatmul.mubr.f32.gmra.mxu1 %v453_v56  ;;  %v545_v55 = vld [vmem:[%s3444_s13 + $0x520] sm:$0xff] }
  0xfc   : > { %843 = vmatprep.mubr.f32.mxu0 %v459_v57  ;;  %1068 = vmatprep.mubr.f32.mxu1 %v461_v58  ;;  %v693_v56 = vld [vmem:[#allocation5 + $0x2c0] sm:$0xff]  ;;  %v542_v57 = vld [vmem:[%s3444_s13 + $0x508] sm:$0xff]  ;;  %v544_v58 = vld [vmem:[%s3444_s13 + $0x518] sm:$0xff] }
  0xfd   : > { %1196 = vmatprep.subr.mxu0 %v3227_v0  ;;  %2782 = vmatprep.subr.mxu1 %v3227_v0 }
  0xfe   : > { %1197 = vmatpush1.msra.mxu0 %v673_v59  ;;  %2814 = vmatpush1.msra.mxu1 %v675_v49  ;;  %v536_v49 = vld [vmem:[%s3444_s13 + $0x4d8] sm:$0xff] }
  0xff   : > { %844 = vmatmul.mubr.f32.gmra.mxu0 %v458_v60  ;;  %1069 = vmatmul.mubr.f32.gmra.mxu1 %v460_v61  ;;  %v552_v60 = vld [vmem:[%s3444_s13 + $0x558] sm:$0xff] }
 0x100   : > { %848 = vmatprep.mubr.f32.mxu0 %v466_v62  ;;  %1073 = vmatprep.mubr.f32.mxu1 %v468_v63  ;;  %v692_v61 = vld [vmem:[#allocation5 + $0x2b8] sm:$0xff]  ;;  %v549_v62 = vld [vmem:[%s3444_s13 + $0x540] sm:$0xff]  ;;  %v551_v63 = vld [vmem:[%s3444_s13 + $0x550] sm:$0xff] }
 0x101   : > { %1198 = vmatprep.subr.mxu0 %v3227_v0  ;;  %2783 = vmatprep.subr.mxu1 %v3227_v0 }
 0x102   : > { %1199 = vmatpush1.msra.mxu0 %v672_v1  ;;  %2815 = vmatpush1.msra.mxu1 %v674_v54  ;;  %v543_v54 = vld [vmem:[%s3444_s13 + $0x510] sm:$0xff] }
 0x103   : > { %849 = vmatmul.mubr.f32.gmra.mxu0 %v465_v2  ;;  %1074 = vmatmul.mubr.f32.gmra.mxu1 %v467_v3  ;;  %v559_v2 = vld [vmem:[%s3444_s13 + $0x590] sm:$0xff] }
 0x104   : > { %853 = vmatprep.mubr.f32.mxu0 %v473_v4  ;;  %1078 = vmatprep.mubr.f32.mxu1 %v475_v5  ;;  %v691_v3 = vld [vmem:[#allocation5 + $0x2b0] sm:$0xff]  ;;  %v556_v4 = vld [vmem:[%s3444_s13 + $0x578] sm:$0xff]  ;;  %v558_v5 = vld [vmem:[%s3444_s13 + $0x588] sm:$0xff] }
 0x105   : > { %1200 = vmatprep.subr.mxu0 %v3227_v0  ;;  %2784 = vmatprep.subr.mxu1 %v3227_v0 }
 0x106   : > { %1201 = vmatpush1.msra.mxu0 %v671_v6  ;;  %2816 = vmatpush1.msra.mxu1 %v673_v59  ;;  %v550_v59 = vld [vmem:[%s3444_s13 + $0x548] sm:$0xff] }
 0x107   : > { %854 = vmatmul.mubr.f32.gmra.mxu0 %v472_v7  ;;  %1079 = vmatmul.mubr.f32.gmra.mxu1 %v474_v8  ;;  %v566_v7 = vld [vmem:[%s3444_s13 + $0x5c8] sm:$0xff] }
 0x108   : > { %858 = vmatprep.mubr.f32.mxu0 %v480_v9  ;;  %1083 = vmatprep.mubr.f32.mxu1 %v482_v10  ;;  %v690_v8 = vld [vmem:[#allocation5 + $0x2a8] sm:$0xff]  ;;  %v563_v9 = vld [vmem:[%s3444_s13 + $0x5b0] sm:$0xff]  ;;  %v565_v10 = vld [vmem:[%s3444_s13 + $0x5c0] sm:$0xff] }
 0x109   : > { %1202 = vmatprep.subr.mxu0 %v3227_v0  ;;  %2785 = vmatprep.subr.mxu1 %v3227_v0 }
 0x10a   : > { %1203 = vmatpush1.msra.mxu0 %v670_v11  ;;  %2817 = vmatpush1.msra.mxu1 %v672_v1  ;;  %v557_v1 = vld [vmem:[%s3444_s13 + $0x580] sm:$0xff] }
 0x10b   : > { %859 = vmatmul.mubr.f32.gmra.mxu0 %v479_v12  ;;  %1084 = vmatmul.mubr.f32.gmra.mxu1 %v481_v13  ;;  %v573_v12 = vld [vmem:[%s3444_s13 + $0x600] sm:$0xff] }
 0x10c   : > { %863 = vmatprep.mubr.f32.mxu0 %v487_v14  ;;  %1088 = vmatprep.mubr.f32.mxu1 %v489_v15  ;;  %v689_v13 = vld [vmem:[#allocation5 + $0x2a0] sm:$0xff]  ;;  %v570_v14 = vld [vmem:[%s3444_s13 + $0x5e8] sm:$0xff]  ;;  %v572_v15 = vld [vmem:[%s3444_s13 + $0x5f8] sm:$0xff] }
 0x10d   : > { %1204 = vmatprep.subr.mxu0 %v3227_v0  ;;  %2786 = vmatprep.subr.mxu1 %v3227_v0 }
 0x10e   : > { %1205 = vmatpush1.msra.mxu0 %v669_v16  ;;  %2818 = vmatpush1.msra.mxu1 %v671_v6  ;;  %v564_v6 = vld [vmem:[%s3444_s13 + $0x5b8] sm:$0xff] }
 0x10f   : > { %864 = vmatmul.mubr.f32.gmra.mxu0 %v486_v17  ;;  %1089 = vmatmul.mubr.f32.gmra.mxu1 %v488_v18  ;;  %v580_v17 = vld [vmem:[%s3444_s13 + $0x638] sm:$0xff] }
 0x110   : > { %868 = vmatprep.mubr.f32.mxu0 %v494_v19  ;;  %1093 = vmatprep.mubr.f32.mxu1 %v496_v20  ;;  %v688_v18 = vld [vmem:[#allocation5 + $0x298] sm:$0xff]  ;;  %v577_v19 = vld [vmem:[%s3444_s13 + $0x620] sm:$0xff]  ;;  %v579_v20 = vld [vmem:[%s3444_s13 + $0x630] sm:$0xff] }
 0x111   : > { %1206 = vmatprep.subr.mxu0 %v3227_v0  ;;  %2787 = vmatprep.subr.mxu1 %v3227_v0 }
 0x112   : > { %1207 = vmatpush2.msra.mxu0 %v700_v21  ;;  %2819 = vmatpush1.msra.mxu1 %v670_v11  ;;  %v571_v11 = vld [vmem:[%s3444_s13 + $0x5f0] sm:$0xff] }
 0x113   : > { %869 = vmatmul.mubr.f32.gmra.mxu0 %v493_v22  ;;  %1094 = vmatmul.mubr.f32.gmra.mxu1 %v495_v23  ;;  %v587_v22 = vld [vmem:[%s3444_s13 + $0x670] sm:$0xff] }
 0x114   : > { %873 = vmatprep.mubr.f32.mxu0 %v501_v24  ;;  %1098 = vmatprep.mubr.f32.mxu1 %v503_v25  ;;  %v687_v23 = vld [vmem:[#allocation5 + $0x290] sm:$0xff]  ;;  %v584_v24 = vld [vmem:[%s3444_s13 + $0x658] sm:$0xff]  ;;  %v586_v25 = vld [vmem:[%s3444_s13 + $0x668] sm:$0xff] }
 0x115   : > { %1208 = vmatprep.subr.mxu0 %v3227_v0  ;;  %2788 = vmatprep.subr.mxu1 %v3227_v0 }
 0x116   : > { %1209 = vmatpush2.msra.mxu0 %v699_v26  ;;  %2820 = vmatpush1.msra.mxu1 %v669_v16  ;;  %v578_v16 = vld [vmem:[%s3444_s13 + $0x628] sm:$0xff] }
 0x117   : > { %874 = vmatmul.mubr.f32.gmra.mxu0 %v500_v27  ;;  %1099 = vmatmul.mubr.f32.gmra.mxu1 %v502_v28  ;;  %v594_v27 = vld [vmem:[%s3444_s13 + $0x6a8] sm:$0xff] }
 0x118   : > { %878 = vmatprep.mubr.f32.mxu0 %v508_v29  ;;  %1103 = vmatprep.mubr.f32.mxu1 %v510_v30  ;;  %v686_v28 = vld [vmem:[#allocation5 + $0x288] sm:$0xff]  ;;  %v591_v29 = vld [vmem:[%s3444_s13 + $0x690] sm:$0xff]  ;;  %v593_v30 = vld [vmem:[%s3444_s13 + $0x6a0] sm:$0xff] }
 0x119   : > { %1210 = vmatprep.subr.mxu0 %v3227_v0  ;;  %2789 = vmatprep.subr.mxu1 %v3227_v0 }
 0x11a   : > { %1211 = vmatpush2.msra.mxu0 %v698_v31  ;;  %2821 = vmatpush2.msra.mxu1 %v700_v21  ;;  %v585_v21 = vld [vmem:[%s3444_s13 + $0x660] sm:$0xff] }
 0x11b   : > { %879 = vmatmul.mubr.f32.gmra.mxu0 %v507_v32  ;;  %1104 = vmatmul.mubr.f32.gmra.mxu1 %v509_v33  ;;  %v601_v32 = vld [vmem:[%s3444_s13 + $0x6e0] sm:$0xff]  ;;  %v598_v33 = vld [vmem:[%s3444_s13 + $0x6c8] sm:$0xff] }
 0x11c   : > { %883 = vmatprep.mubr.f32.mxu0 %v515_v34  ;;  %1108 = vmatprep.mubr.f32.mxu1 %v517_v35  ;;  %v600_v34 = vld [vmem:[%s3444_s13 + $0x6d8] sm:$0xff]  ;;  %v685_v35 = vld [vmem:[#allocation5 + $0x280] sm:$0xff] }
 0x11d   : > { %1212 = vmatprep.subr.mxu0 %v3227_v0  ;;  %2790 = vmatprep.subr.mxu1 %v3227_v0 }
 0x11e   : > { %1213 = vmatpush2.msra.mxu0 %v697_v36  ;;  %2822 = vmatpush2.msra.mxu1 %v699_v26  ;;  %v592_v26 = vld [vmem:[%s3444_s13 + $0x698] sm:$0xff] }
 0x11f   : > { %884 = vmatmul.mubr.f32.gmra.mxu0 %v514_v37  ;;  %1109 = vmatmul.mubr.f32.gmra.mxu1 %v516_v38  ;;  %v554_v37 = vld [vmem:[%s3444_s13 + $0x568] sm:$0xff]  ;;  %v385_v38 = vld [vmem:[%s3444_s13 + $0x20] sm:$0xff] }
 0x120   : > { %888 = vmatprep.mubr.f32.mxu0 %v522_v39  ;;  %1113 = vmatprep.mubr.f32.mxu1 %v524_v40  ;;  %v553_v39 = vld [vmem:[%s3444_s13 + $0x560] sm:$0xff]  ;;  %v716_v40 = vld [vmem:[#allocation5 + $0x378] sm:$0xff] }
 0x121   : > { %1214 = vmatprep.subr.mxu0 %v3227_v0  ;;  %2791 = vmatprep.subr.mxu1 %v3227_v0 }
 0x122   : > { %1215 = vmatpush2.msra.mxu0 %v696_v41  ;;  %2823 = vmatpush2.msra.mxu1 %v698_v31  ;;  %v599_v31 = vld [vmem:[%s3444_s13 + $0x6d0] sm:$0xff] }
 0x123   : > { %889 = vmatmul.mubr.f32.gmra.mxu0 %v521_v42  ;;  %1114 = vmatmul.mubr.f32.gmra.mxu1 %v523_v43  ;;  %v561_v42 = vld [vmem:[%s3444_s13 + $0x5a0] sm:$0xff]  ;;  %v715_v43 = vld [vmem:[#allocation5 + $0x370] sm:$0xff] }
 0x124   : > { %893 = vmatprep.mubr.f32.mxu0 %v529_v44  ;;  %1118 = vmatprep.mubr.f32.mxu1 %v531_v45  ;;  %v392_v44 = vld [vmem:[%s3444_s13 + $0x58] sm:$0xff] }
 0x125   : > { %1216 = vmatprep.subr.mxu0 %v3227_v0  ;;  %2792 = vmatprep.subr.mxu1 %v3227_v0  ;;  %v560_v45 = vld [vmem:[%s3444_s13 + $0x598] sm:$0xff] }
 0x126   : > { %1217 = vmatpush2.msra.mxu0 %v695_v46  ;;  %2824 = vmatpush2.msra.mxu1 %v697_v36  ;;  %v386_v36 = vld [vmem:[%s3444_s13 + $0x28] sm:$0xff] }
 0x127   : > { %894 = vmatmul.mubr.f32.gmra.mxu0 %v528_v47  ;;  %1119 = vmatmul.mubr.f32.gmra.mxu1 %v530_v48  ;;  %v713_v47 = vld [vmem:[#allocation5 + $0x360] sm:$0xff]  ;;  %v568_v48 = vld [vmem:[%s3444_s13 + $0x5d8] sm:$0xff] }
 0x128   : > { %898 = vmatprep.mubr.f32.mxu0 %v536_v49  ;;  %1123 = vmatprep.mubr.f32.mxu1 %v538_v50  ;;  %v399_v49 = vld [vmem:[%s3444_s13 + $0x90] sm:$0xff] }
 0x129   : > { %1218 = vmatprep.subr.mxu0 %v3227_v0  ;;  %2793 = vmatprep.subr.mxu1 %v3227_v0  ;;  %v567_v50 = vld [vmem:[%s3444_s13 + $0x5d0] sm:$0xff] }
 0x12a   : > { %1219 = vmatpush2.msra.mxu0 %v694_v51  ;;  %2825 = vmatpush2.msra.mxu1 %v696_v41  ;;  %v393_v41 = vld [vmem:[%s3444_s13 + $0x60] sm:$0xff] }
 0x12b   : > { %899 = vmatmul.mubr.f32.gmra.mxu0 %v535_v52  ;;  %1124 = vmatmul.mubr.f32.gmra.mxu1 %v537_v53  ;;  %v407_v52 = vld [vmem:[%s3444_s13 + $0xd0] sm:$0xff] }
 0x12c   : > { %903 = vmatprep.mubr.f32.mxu0 %v543_v54  ;;  %1128 = vmatprep.mubr.f32.mxu1 %v545_v55  ;;  %v711_v53 = vld [vmem:[#allocation5 + $0x350] sm:$0xff]  ;;  %v406_v55 = vld [vmem:[%s3444_s13 + $0xc8] sm:$0xff] }
 0x12d   : > { %1220 = vmatprep.subr.mxu0 %v3227_v0  ;;  %2794 = vmatprep.subr.mxu1 %v3227_v0  ;;  %v575_v54 = vld [vmem:[%s3444_s13 + $0x610] sm:$0xff] }
 0x12e   : > { %1221 = vmatpush2.msra.mxu0 %v693_v56  ;;  %2826 = vmatpush2.msra.mxu1 %v695_v46  ;;  %v400_v46 = vld [vmem:[%s3444_s13 + $0x98] sm:$0xff] }
 0x12f   : > { %904 = vmatmul.mubr.f32.gmra.mxu0 %v542_v57  ;;  %1129 = vmatmul.mubr.f32.gmra.mxu1 %v544_v58  ;;  %v710_v57 = vld [vmem:[#allocation5 + $0x348] sm:$0xff] }
 0x130   : > { %908 = vmatprep.mubr.f32.mxu0 %v550_v59  ;;  %1133 = vmatprep.mubr.f32.mxu1 %v552_v60  ;;  %v414_v58 = vld [vmem:[%s3444_s13 + $0x108] sm:$0xff]  ;;  %v709_v59 = vld [vmem:[#allocation5 + $0x340] sm:$0xff] }
 0x131   : > { %1222 = vmatprep.subr.mxu0 %v3227_v0  ;;  %2795 = vmatprep.subr.mxu1 %v3227_v0  ;;  %v582_v60 = vld [vmem:[%s3444_s13 + $0x648] sm:$0xff] }
 0x132   : > { %1223 = vmatpush2.msra.mxu0 %v692_v61  ;;  %2827 = vmatpush2.msra.mxu1 %v694_v51  ;;  %v712_v51 = vld [vmem:[#allocation5 + $0x358] sm:$0xff] }
 0x133   : > { %909 = vmatmul.mubr.f32.gmra.mxu0 %v549_v62  ;;  %1134 = vmatmul.mubr.f32.gmra.mxu1 %v551_v63  ;;  %v581_v62 = vld [vmem:[%s3444_s13 + $0x640] sm:$0xff]  ;;  %v708_v63 = vld [vmem:[#allocation5 + $0x338] sm:$0xff] }
 0x134   : > { %913 = vmatprep.mubr.f32.mxu0 %v557_v1  ;;  %1138 = vmatprep.mubr.f32.mxu1 %v559_v2  ;;  %v421_v1 = vld [vmem:[%s3444_s13 + $0x140] sm:$0xff]  ;;  %v707_v2 = vld [vmem:[#allocation5 + $0x330] sm:$0xff] }
 0x135   : > { %1224 = vmatprep.subr.mxu0 %v3227_v0  ;;  %2796 = vmatprep.subr.mxu1 %v3227_v0 }
 0x136   : > { %1225 = vmatpush2.msra.mxu0 %v691_v3  ;;  %2828 = vmatpush2.msra.mxu1 %v693_v56  ;;  %v574_v56 = vld [vmem:[%s3444_s13 + $0x608] sm:$0xff] }
 0x137   : > { %914 = vmatmul.mubr.f32.gmra.mxu0 %v556_v4  ;;  %1139 = vmatmul.mubr.f32.gmra.mxu1 %v558_v5  ;;  %v420_v4 = vld [vmem:[%s3444_s13 + $0x138] sm:$0xff] }
 0x138   : > { %918 = vmatprep.mubr.f32.mxu0 %v564_v6  ;;  %1143 = vmatprep.mubr.f32.mxu1 %v566_v7  ;;  %v588_v5 = vld [vmem:[%s3444_s13 + $0x678] sm:$0xff]  ;;  %v706_v6 = vld [vmem:[#allocation5 + $0x328] sm:$0xff] }
 0x139   : > { %1226 = vmatprep.subr.mxu0 %v3227_v0  ;;  %2797 = vmatprep.subr.mxu1 %v3227_v0  ;;  %v428_v7 = vld [vmem:[%s3444_s13 + $0x178] sm:$0xff] }
 0x13a   : > { %1227 = vmatpush2.msra.mxu0 %v690_v8  ;;  %2829 = vmatpush2.msra.mxu1 %v692_v61  ;;  %v413_v61 = vld [vmem:[%s3444_s13 + $0x100] sm:$0xff] }
 0x13b   : > { %919 = vmatmul.mubr.f32.gmra.mxu0 %v563_v9  ;;  %1144 = vmatmul.mubr.f32.gmra.mxu1 %v565_v10  ;;  %v596_v9 = vld [vmem:[%s3444_s13 + $0x6b8] sm:$0xff]  ;;  %v427_v10 = vld [vmem:[%s3444_s13 + $0x170] sm:$0xff] }
 0x13c   : > { %923 = vmatprep.mubr.f32.mxu0 %v571_v11  ;;  %1148 = vmatprep.mubr.f32.mxu1 %v573_v12  ;;  %v595_v11 = vld [vmem:[%s3444_s13 + $0x6b0] sm:$0xff]  ;;  %v704_v12 = vld [vmem:[#allocation5 + $0x318] sm:$0xff] }
 0x13d   : > { %1228 = vmatprep.subr.mxu0 %v3227_v0  ;;  %2798 = vmatprep.subr.mxu1 %v3227_v0 }
 0x13e   : > { %1229 = vmatpush2.msra.mxu0 %v689_v13  ;;  %2830 = vmatpush2.msra.mxu1 %v691_v3  ;;  %v589_v3 = vld [vmem:[%s3444_s13 + $0x680] sm:$0xff] }
 0x13f   : > { %924 = vmatmul.mubr.f32.gmra.mxu0 %v570_v14  ;;  %1149 = vmatmul.mubr.f32.gmra.mxu1 %v572_v15  ;;  %v703_v14 = vld [vmem:[#allocation5 + $0x310] sm:$0xff] }
 0x140   : > { %928 = vmatprep.mubr.f32.mxu0 %v578_v16  ;;  %1153 = vmatprep.mubr.f32.mxu1 %v580_v17  ;;  %v603_v15 = vld [vmem:[%s3444_s13 + $0x6f0] sm:$0xff]  ;;  %v434_v16 = vld [vmem:[%s3444_s13 + $0x1a8] sm:$0xff] }
 0x141   : > { %1230 = vmatprep.subr.mxu0 %v3227_v0  ;;  %2799 = vmatprep.subr.mxu1 %v3227_v0  ;;  %v602_v17 = vld [vmem:[%s3444_s13 + $0x6e8] sm:$0xff] }
 0x142   : > { %1231 = vmatpush2.msra.mxu0 %v688_v18  ;;  %2831 = vmatpush2.msra.mxu1 %v690_v8  ;;  %v705_v8 = vld [vmem:[#allocation5 + $0x320] sm:$0xff] }
 0x143   : > { %929 = vmatmul.mubr.f32.gmra.mxu0 %v577_v19  ;;  %1154 = vmatmul.mubr.f32.gmra.mxu1 %v579_v20  ;;  %v442_v19 = vld [vmem:[%s3444_s13 + $0x1e8] sm:$0xff]  ;;  %v701_v20 = vld [vmem:[#allocation5 + $0x300] sm:$0xff] }
 0x144   : > { %933 = vmatprep.mubr.f32.mxu0 %v585_v21  ;;  %1158 = vmatprep.mubr.f32.mxu1 %v587_v22  ;;  %v387_v21 = vld [vmem:[%s3444_s13 + $0x30] sm:$0xff]  ;;  %v441_v22 = vld [vmem:[%s3444_s13 + $0x1e0] sm:$0xff] }
 0x145   : > { %1232 = vmatprep.subr.mxu0 %v3227_v0  ;;  %2800 = vmatprep.subr.mxu1 %v3227_v0 }
 0x146   : > { %1233 = vmatpush2.msra.mxu0 %v687_v23  ;;  %2832 = vmatpush2.msra.mxu1 %v689_v13  ;;  %v435_v13 = vld [vmem:[%s3444_s13 + $0x1b0] sm:$0xff] }
 0x147   : > { %934 = vmatmul.mubr.f32.gmra.mxu0 %v584_v24  ;;  %1159 = vmatmul.mubr.f32.gmra.mxu1 %v586_v25  ;;  %v449_v24 = vld [vmem:[%s3444_s13 + $0x220] sm:$0xff] }
 0x148   : > { %938 = vmatprep.mubr.f32.mxu0 %v592_v26  ;;  %1163 = vmatprep.mubr.f32.mxu1 %v594_v27  ;;  %v401_v25 = vld [vmem:[%s3444_s13 + $0xa0] sm:$0xff]  ;;  %v448_v26 = vld [vmem:[%s3444_s13 + $0x218] sm:$0xff] }
 0x149   : > { %2801 = vmatprep.subr.mxu1 %v3227_v0  ;;  %1234 = vmatprep.subr.mxu0 %v3227_v0  ;;  %v408_v27 = vld [vmem:[%s3444_s13 + $0xd8] sm:$0xff] }
 0x14a   : > { %2833 = vmatpush2.msra.mxu1 %v688_v18  ;;  %1235 = vmatpush2.msra.mxu0 %v686_v28  ;;  %v702_v18 = vld [vmem:[#allocation5 + $0x308] sm:$0xff] }
 0x14b   : > { %939 = vmatmul.mubr.f32.gmra.mxu0 %v591_v29  ;;  %1164 = vmatmul.mubr.f32.gmra.mxu1 %v593_v30  ;;  %v415_v29 = vld [vmem:[%s3444_s13 + $0x110] sm:$0xff] }
 0x14c   : > { %2802 = vmatprep.subr.mxu1 %v3227_v0  ;;  %943 = vmatprep.mubr.f32.mxu0 %v599_v31  ;;  %v455_v30 = vld [vmem:[%s3444_s13 + $0x250] sm:$0xff]  ;;  %v422_v31 = vld [vmem:[%s3444_s13 + $0x148] sm:$0xff] }
 0x14d   : > { %1168 = vmatprep.mubr.f32.mxu1 %v601_v32  ;;  %2834 = vmatpush2.msra.mxu1 %v687_v23  ;;  %v394_v23 = vld [vmem:[%s3444_s13 + $0x68] sm:$0xff]  ;;  %v463_v32 = vld [vmem:[%s3444_s13 + $0x290] sm:$0xff] }
 0x14e   : > { %2803 = vmatprep.subr.mxu1 %v3227_v0  ;;  %1236 = vmatprep.subr.mxu0 %v3227_v0 }
 0x14f   : > { %944 = vmatmul.mubr.f32.gmra.mxu0 %v598_v33  ;;  %1169 = vmatmul.mubr.f32.gmra.mxu1 %v600_v34  ;;  %v429_v33 = vld [vmem:[%s3444_s13 + $0x180] sm:$0xff]  ;;  %v462_v34 = vld [vmem:[%s3444_s13 + $0x288] sm:$0xff] }
 0x150   : > { %2835 = vmatpush2.msra.mxu1 %v686_v28  ;;  %1237 = vmatpush2.msra.mxu0 %v685_v35  ;;  %v456_v28 = vld [vmem:[%s3444_s13 + $0x258] sm:$0xff] }
 0x151   : > { %2804 = vmatprep.subr.mxu1 %v3227_v0  ;;  %1238 = vmatprep.mubr.f32.mxu0 %v386_v36  ;;  %v714_v0 = vld [vmem:[#allocation5 + $0x368] sm:$0xff] }
 0x152   : > { %2836 = vmatpush2.msra.mxu1 %v685_v35  ;;  %1358 = vmatprep.mubr.f32.mxu1 %v554_v37  ;;  %v436_v35 = vld [vmem:[%s3444_s13 + $0x1b8] sm:$0xff]  ;;  %v470_v36 = vld [vmem:[%s3444_s13 + $0x2c8] sm:$0xff]  ;;  %v443_v37 = vld [vmem:[%s3444_s13 + $0x1f0] sm:$0xff] }
 0x153   : > { %1239 = vmatmul.mubr.f32.vlgmr.msra.gmra.mxu0 %v385_v38  ;;  %1359 = vmatmul.mubr.f32.vlgmr.msra.gmra.mxu1 %v553_v39  ;;  %v469_v38 = vld [vmem:[%s3444_s13 + $0x2c0] sm:$0xff]  ;;  %v450_v39 = vld [vmem:[%s3444_s13 + $0x228] sm:$0xff] }
 0x154   : > { %2533 = vmatprep.subr.mxu1 %v716_v40  ;;  %1243 = vmatprep.mubr.f32.mxu0 %v393_v41  ;;  %v457_v41 = vld [vmem:[%s3444_s13 + $0x260] sm:$0xff] }
 0x155   : > { %2534 = vmatpush3.msra.mxu1 %v716_v40  ;;  %1363 = vmatprep.mubr.f32.mxu1 %v561_v42  ;;  %v477_v40 = vld [vmem:[%s3444_s13 + $0x300] sm:$0xff]  ;;  %v476_v42 = vld [vmem:[%s3444_s13 + $0x2f8] sm:$0xff] }
 0x156   : > { %2535 = vmatprep.subr.mxu1 %v715_v43 }
 0x157   : > { %2536 = vmatpush3.msra.mxu1 %v715_v43  ;;  %1244 = vmatmul.mubr.f32.gmra.mxu0 %v392_v44  ;;  %v464_v43 = vld [vmem:[%s3444_s13 + $0x298] sm:$0xff] }
 0x158   : > { %1364 = vmatmul.mubr.f32.gmra.mxu1 %v560_v45  ;;  %2537 = vmatprep.subr.mxu1 %v714_v0  ;;  %v484_v44 = vld [vmem:[%s3444_s13 + $0x338] sm:$0xff]  ;;  %v471_v45 = vld [vmem:[%s3444_s13 + $0x2d0] sm:$0xff] }
 0x159   : > { %2538 = vmatpush3.msra.mxu1 %v714_v0  ;;  %1248 = vmatprep.mubr.f32.mxu0 %v400_v46  ;;  %v483_v0 = vld [vmem:[%s3444_s13 + $0x330] sm:$0xff]  ;;  %v478_v46 = vld [vmem:[%s3444_s13 + $0x308] sm:$0xff] }
 0x15a   : > { %2539 = vmatprep.subr.mxu1 %v713_v47  ;;  %1368 = vmatprep.mubr.f32.mxu1 %v568_v48  ;;  %v485_v48 = vld [vmem:[%s3444_s13 + $0x340] sm:$0xff] }
 0x15b   : > { %2540 = vmatpush3.msra.mxu1 %v713_v47  ;;  %1249 = vmatmul.mubr.f32.gmra.mxu0 %v399_v49  ;;  %v491_v47 = vld [vmem:[%s3444_s13 + $0x370] sm:$0xff]  ;;  %v1671_v49 = vld [vmem:[#allocation8 + $0x78] sm:$0xff] }
 0x15c   : > { %1369 = vmatmul.mubr.f32.gmra.mxu1 %v567_v50  ;;  %2541 = vmatprep.subr.mxu1 %v712_v51  ;;  %v490_v50 = vld [vmem:[%s3444_s13 + $0x368] sm:$0xff] }
 0x15d   : > { %2542 = vmatpush3.msra.mxu1 %v712_v51  ;;  %1253 = vmatprep.mubr.f32.mxu0 %v407_v52  ;;  %v492_v51 = vld [vmem:[%s3444_s13 + $0x378] sm:$0xff]  ;;  %v498_v52 = vld [vmem:[%s3444_s13 + $0x3a8] sm:$0xff] }
 0x15e   : > { %2543 = vmatprep.subr.mxu1 %v711_v53  ;;  %1373 = vmatprep.mubr.f32.mxu1 %v575_v54  ;;  %v1670_v54 = vld [vmem:[#allocation8 + $0x70] sm:$0xff] }
 0x15f   : > { %2544 = vmatpush3.msra.mxu1 %v711_v53  ;;  %1254 = vmatmul.mubr.f32.gmra.mxu0 %v406_v55  ;;  %v499_v53 = vld [vmem:[%s3444_s13 + $0x3b0] sm:$0xff]  ;;  %v497_v55 = vld [vmem:[%s3444_s13 + $0x3a0] sm:$0xff] }
 0x160   : > { %1374 = vmatmul.mubr.f32.gmra.mxu1 %v574_v56  ;;  %2545 = vmatprep.subr.mxu1 %v710_v57  ;;  %v3785_v56 = vld [vmem:[#allocation7] ss:$0 sm:$0xff] }
 0x161   : > { %2546 = vmatpush3.msra.mxu1 %v710_v57  ;;  %1258 = vmatprep.mubr.f32.mxu0 %v414_v58  ;;  %v506_v57 = vld [vmem:[%s3444_s13 + $0x3e8] sm:$0xff]  ;;  %v505_v58 = vld [vmem:[%s3444_s13 + $0x3e0] sm:$0xff] }
 0x162   : > { %2547 = vmatprep.subr.mxu1 %v709_v59  ;;  %1378 = vmatprep.mubr.f32.mxu1 %v582_v60  ;;  %v1669_v60 = vld [vmem:[#allocation8 + $0x68] sm:$0xff] }
 0x163   : > { %2548 = vmatpush3.msra.mxu1 %v709_v59  ;;  %1259 = vmatmul.mubr.f32.gmra.mxu0 %v413_v61  ;;  %v513_v59 = vld [vmem:[%s3444_s13 + $0x420] sm:$0xff] }
 0x164   : > { %1379 = vmatmul.mubr.f32.gmra.mxu1 %v581_v62  ;;  %2549 = vmatprep.subr.mxu1 %v708_v63 }
 0x165   : > { %2550 = vmatpush3.msra.mxu1 %v708_v63  ;;  %1263 = vmatprep.mubr.f32.mxu0 %v421_v1  ;;  %v504_v1 = vld [vmem:[%s3444_s13 + $0x3d8] sm:$0xff] }
 0x166   : > { %2551 = vmatprep.subr.mxu1 %v707_v2  ;;  %1383 = vmatprep.mubr.f32.mxu1 %v589_v3 }
 0x167   : > { %2552 = vmatpush3.msra.mxu1 %v707_v2  ;;  %1264 = vmatmul.mubr.f32.gmra.mxu0 %v420_v4  ;;  %v520_v4 = vld [vmem:[%s3444_s13 + $0x458] sm:$0xff] }
 0x168   : > { %1384 = vmatmul.mubr.f32.gmra.mxu1 %v588_v5  ;;  %2553 = vmatprep.subr.mxu1 %v706_v6  ;;  %v512_v5 = vld [vmem:[%s3444_s13 + $0x418] sm:$0xff] }
 0x169   : > { %2554 = vmatpush3.msra.mxu1 %v706_v6  ;;  %1268 = vmatprep.mubr.f32.mxu0 %v428_v7  ;;  %v1668_v6 = vld [vmem:[#allocation8 + $0x60] sm:$0xff] }
 0x16a   : > { %2555 = vmatprep.subr.mxu1 %v705_v8  ;;  %1388 = vmatprep.mubr.f32.mxu1 %v596_v9 }
 0x16b   : > { %2556 = vmatpush3.msra.mxu1 %v705_v8  ;;  %1269 = vmatmul.mubr.f32.gmra.mxu0 %v427_v10  ;;  %v527_v8 = vld [vmem:[%s3444_s13 + $0x490] sm:$0xff] }
 0x16c   : > { %1389 = vmatmul.mubr.f32.gmra.mxu1 %v595_v11  ;;  %2557 = vmatprep.subr.mxu1 %v704_v12 }
 0x16d   : > { %2558 = vmatpush3.msra.mxu1 %v704_v12  ;;  %1273 = vmatprep.mubr.f32.mxu0 %v435_v13  ;;  %v511_v12 = vld [vmem:[%s3444_s13 + $0x410] sm:$0xff] }
 0x16e   : > { %2559 = vmatprep.subr.mxu1 %v703_v14  ;;  %1393 = vmatprep.mubr.f32.mxu1 %v603_v15  ;;  %v534_v15 = vld [vmem:[%s3444_s13 + $0x4c8] sm:$0xff] }
 0x16f   : > { %2560 = vmatpush3.msra.mxu1 %v703_v14  ;;  %1274 = vmatmul.mubr.f32.gmra.mxu0 %v434_v16  ;;  %v519_v16 = vld [vmem:[%s3444_s13 + $0x450] sm:$0xff] }
 0x170   : > { %1394 = vmatmul.mubr.f32.gmra.mxu1 %v602_v17  ;;  %2561 = vmatprep.subr.mxu1 %v702_v18 }
 0x171   : > { %2562 = vmatpush3.msra.mxu1 %v702_v18  ;;  %1278 = vmatprep.mubr.f32.mxu0 %v442_v19  ;;  %v541_v18 = vld [vmem:[%s3444_s13 + $0x500] sm:$0xff] }
 0x172   : > { %2563 = vmatprep.subr.mxu1 %v701_v20  ;;  %2565 = vmatprep.mubr.f32.mxu1 %v387_v21  ;;  %v1667_v19 = vld [vmem:[#allocation8 + $0x58] sm:$0xff] }
 0x173   : > { %2564 = vmatpush3.msra.mxu1 %v701_v20  ;;  %1279 = vmatmul.mubr.f32.gmra.mxu0 %v441_v22 }
 0x174   : > { %2566 = vmatmul.mubr.f32.vlgmr.msra.gmra.mxu1 %v394_v23  ;;  %1283 = vmatprep.mubr.f32.mxu0 %v449_v24  ;;  %v518_v23 = vld [vmem:[%s3444_s13 + $0x448] sm:$0xff] }
 0x175   : > { %2568 = vmatprep.mubr.f32.mxu1 %v401_v25  ;;  %2613 = vmatprep.subr.mxu1 %v1671_v49 }
 0x176   : > { %2614 = vmatpush3.msra.mxu1 %v1671_v49 }
 0x177   : > { %1284 = vmatmul.mubr.f32.gmra.mxu0 %v448_v26  ;;  %2615 = vmatprep.subr.mxu1 %v1670_v54  ;;  %v548_v26 = vld [vmem:[%s3444_s13 + $0x538] sm:$0xff] }
 0x178   : > { %2569 = vmatmul.mubr.f32.gmra.mxu1 %v408_v27  ;;  %1288 = vmatprep.mubr.f32.mxu0 %v456_v28  ;;  %v526_v27 = vld [vmem:[%s3444_s13 + $0x488] sm:$0xff] }
 0x179   : > { %2571 = vmatprep.mubr.f32.mxu1 %v415_v29  ;;  %2616 = vmatpush3.msra.mxu1 %v1670_v54  ;;  %v555_v29 = vld [vmem:[%s3444_s13 + $0x570] sm:$0xff] }
 0x17a   : > { %2617 = vmatprep.subr.mxu1 %v1669_v60 }
 0x17b   : > { %1289 = vmatmul.mubr.f32.gmra.mxu0 %v455_v30  ;;  %2618 = vmatpush3.msra.mxu1 %v1669_v60  ;;  %v1666_v30 = vld [vmem:[#allocation8 + $0x50] sm:$0xff] }
 0x17c   : > { %2572 = vmatmul.mubr.f32.gmra.mxu1 %v422_v31  ;;  %1293 = vmatprep.mubr.f32.mxu0 %v463_v32  ;;  %v547_v60 = vld [vmem:[%s3444_s13 + $0x530] sm:$0xff] }
 0x17d   : > { %2574 = vmatprep.mubr.f32.mxu1 %v429_v33  ;;  %2619 = vmatprep.subr.mxu1 %v1668_v6 }
 0x17e   : > { %2620 = vmatpush3.msra.mxu1 %v1668_v6 }
 0x17f   : > { %1294 = vmatmul.mubr.f32.gmra.mxu0 %v462_v34  ;;  %2621 = vmatprep.subr.mxu1 %v1667_v19  ;;  %v525_v34 = vld [vmem:[%s3444_s13 + $0x480] sm:$0xff] }
 0x180   : > { %2575 = vmatmul.mubr.f32.gmra.mxu1 %v436_v35  ;;  %1298 = vmatprep.mubr.f32.mxu0 %v470_v36 }
 0x181   : > { %2577 = vmatprep.mubr.f32.mxu1 %v443_v37  ;;  %2622 = vmatpush3.msra.mxu1 %v1667_v19  ;;  %v562_v37 = vld [vmem:[%s3444_s13 + $0x5a8] sm:$0xff] }
 0x182   : > { %2623 = vmatprep.subr.mxu1 %v1666_v30 }
 0x183   : > { %1299 = vmatmul.mubr.f32.gmra.mxu0 %v469_v38  ;;  %v533_v38 = vld [vmem:[%s3444_s13 + $0x4c0] sm:$0xff]  ;;  %2624 = vmatpush3.msra.mxu1 %v1666_v30 }
 0x184   : > { %2578 = vmatmul.mubr.f32.gmra.mxu1 %v450_v39  ;;  %1303 = vmatprep.mubr.f32.mxu0 %v477_v40  ;;  %v569_v40 = vld [vmem:[%s3444_s13 + $0x5e0] sm:$0xff] }
 0x185   : > { %2580 = vmatprep.mubr.f32.mxu1 %v457_v41  ;;  %v1665_v41 = vld [vmem:[#allocation8 + $0x48] sm:$0xff] }
 0x186   : > { %2625 = vmatprep.subr.mxu1 %v1665_v41 }
 0x187   : > { %1304 = vmatmul.mubr.f32.gmra.mxu0 %v476_v42  ;;  %2626 = vmatpush3.msra.mxu1 %v1665_v41 }
 0x188   : > { %2581 = vmatmul.mubr.f32.gmra.mxu1 %v464_v43  ;;  %1308 = vmatprep.mubr.f32.mxu0 %v484_v44 }
 0x189   : > { %2583 = vmatprep.mubr.f32.mxu1 %v471_v45  ;;  %v532_v45 = vld [vmem:[%s3444_s13 + $0x4b8] sm:$0xff] }
 0x18b   : > { %1309 = vmatmul.mubr.f32.gmra.mxu0 %v483_v0 }
 0x18c   : > { %2584 = vmatmul.mubr.f32.gmra.mxu1 %v478_v46  ;;  %1313 = vmatprep.mubr.f32.mxu0 %v491_v47  ;;  %v576_v47 = vld [vmem:[%s3444_s13 + $0x618] sm:$0xff] }
 0x18d   : > { %2586 = vmatprep.mubr.f32.mxu1 %v485_v48  ;;  %v540_v48 = vld [vmem:[%s3444_s13 + $0x4f8] sm:$0xff] }
 0x18f   : > { %1314 = vmatmul.mubr.f32.gmra.mxu0 %v490_v50  ;;  %v583_v50 = vld [vmem:[%s3444_s13 + $0x650] sm:$0xff] }
 0x190   : > { %2587 = vmatmul.mubr.f32.gmra.mxu1 %v492_v51  ;;  %1318 = vmatprep.mubr.f32.mxu0 %v498_v52  ;;  %v1664_v51 = vld [vmem:[#allocation8 + $0x40] sm:$0xff] }
 0x191   : > { %2589 = vmatprep.mubr.f32.mxu1 %v499_v53  ;;  %2627 = vmatprep.subr.mxu1 %v1664_v51 }
 0x192   : > { %2628 = vmatpush3.msra.mxu1 %v1664_v51 }
 0x193   : > { %v790_v61 = vpop.f32.mrf.mxu0  ;;  %v1015_v62 = vpop.f32.mrf.mxu1  ;;  %1319 = vmatmul.mubr.f32.gmra.mxu0 %v497_v55  ;;  %v539_v55 = vld [vmem:[%s3444_s13 + $0x4f0] sm:$0xff] }
 0x194   : > { %v791_v63 = vadd.f32 %v3785_v56, %v790_v61  ;;  %2590 = vmatmul.mubr.f32.gmra.mxu1 %v506_v57  ;;  %1323 = vmatprep.mubr.f32.mxu0 %v505_v58 }
 0x195   : > { %v792_v2 = vpop.f32.mrf.mxu0  ;;  %v1017_v3 = vpop.f32.mrf.mxu1  ;;  %2592 = vmatprep.mubr.f32.mxu1 %v513_v59  ;;  %v590_v59 = vld [vmem:[%s3444_s13 + $0x688] sm:$0xff] }
 0x196   : > { %v3794_v7 = vadd.f32 %v1015_v62, %v791_v63  ;;  %v597_v62 = vld [vmem:[%s3444_s13 + $0x6c0] sm:$0xff] }
 0x197   : > { %v795_v9 = vpop.f32.mrf.mxu0  ;;  %v1020_v10 = vpop.f32.mrf.mxu1  ;;  %1324 = vmatmul.mubr.f32.gmra.mxu0 %v504_v1  ;;  %v1663_v63 = vld [vmem:[#allocation8 + $0x38] sm:$0xff] }
 0x198   : > { %v796_v11 = vadd.f32 %v3785_v56, %v795_v9  ;;  %2593 = vmatmul.mubr.f32.gmra.mxu1 %v520_v4  ;;  %1328 = vmatprep.mubr.f32.mxu0 %v512_v5  ;;  %v546_v4 = vld [vmem:[%s3444_s13 + $0x528] sm:$0xff]  ;;  %v1662_v9 = vld [vmem:[#allocation8 + $0x30] sm:$0xff] }
 0x199   : > { %v797_v13 = vpop.f32.mrf.mxu0  ;;  %v1022_v14 = vpop.f32.mrf.mxu1  ;;  %2595 = vmatprep.mubr.f32.mxu1 %v527_v8  ;;  %2629 = vmatprep.subr.mxu1 %v1663_v63  ;;  %v604_v8 = vld [vmem:[%s3444_s13 + $0x6f8] sm:$0xff] }
 0x19a   : > { %v3801_v17 = vadd.f32 %v1020_v10, %v796_v11  ;;  %2630 = vmatpush3.msra.mxu1 %v1663_v63  ;;  %v1661_v13 = vld [vmem:[#allocation8 + $0x28] sm:$0xff] }
 0x19b   : > { %v800_v20 = vpop.f32.mrf.mxu0  ;;  %v1025_v21 = vpop.f32.mrf.mxu1  ;;  %1329 = vmatmul.mubr.f32.gmra.mxu0 %v511_v12  ;;  %2631 = vmatprep.subr.mxu1 %v1662_v9 }
 0x19c   : > { %v801_v22 = vadd.f32 %v3785_v56, %v800_v20  ;;  %2596 = vmatmul.mubr.f32.gmra.mxu1 %v534_v15  ;;  %1333 = vmatprep.mubr.f32.mxu0 %v519_v16 }
 0x19d   : > { %v802_v24 = vpop.f32.mrf.mxu0  ;;  %v1027_v25 = vpop.f32.mrf.mxu1  ;;  %2598 = vmatprep.mubr.f32.mxu1 %v541_v18  ;;  %2632 = vmatpush3.msra.mxu1 %v1662_v9  ;;  %v1660_v18 = vld [vmem:[#allocation8 + $0x20] sm:$0xff] }
 0x19e   : > { %v3808_v28 = vadd.f32 %v1025_v21, %v801_v22  ;;  %2633 = vmatprep.subr.mxu1 %v1661_v13  ;;  %v1659_v22 = vld [vmem:[#allocation8 + $0x18] sm:$0xff] }
 0x19f   : > { %v805_v31 = vpop.f32.mrf.mxu0  ;;  %v1030_v32 = vpop.f32.mrf.mxu1  ;;  %1334 = vmatmul.mubr.f32.gmra.mxu0 %v518_v23  ;;  %2634 = vmatpush3.msra.mxu1 %v1661_v13 }
 0x1a0   : > { %v806_v33 = vadd.f32 %v3785_v56, %v805_v31  ;;  %2599 = vmatmul.mubr.f32.gmra.mxu1 %v548_v26  ;;  %1338 = vmatprep.mubr.f32.mxu0 %v526_v27  ;;  %v1658_v26 = vld [vmem:[#allocation8 + $0x10] sm:$0xff]  ;;  %v1657_v31 = vld [vmem:[#allocation8 + $0x8] sm:$0xff] }
 0x1a1   : > { %v807_v35 = vpop.f32.mrf.mxu0  ;;  %v1032_v36 = vpop.f32.mrf.mxu1  ;;  %2601 = vmatprep.mubr.f32.mxu1 %v555_v29  ;;  %2635 = vmatprep.subr.mxu1 %v1660_v18 }
 0x1a2   : > { %v3815_v39 = vadd.f32 %v1030_v32, %v806_v33  ;;  %2636 = vmatpush3.msra.mxu1 %v1660_v18  ;;  %v1656_v35 = vld [vmem:[#allocation8] sm:$0xff] }
 0x1a3   : > { %v810_v42 = vpop.f32.mrf.mxu0  ;;  %v1035_v43 = vpop.f32.mrf.mxu1  ;;  %1339 = vmatmul.mubr.f32.gmra.mxu0 %v525_v34  ;;  %2637 = vmatprep.subr.mxu1 %v1659_v22 }
 0x1a4   : > { %v811_v44 = vadd.f32 %v3785_v56, %v810_v42  ;;  %2602 = vmatmul.mubr.f32.gmra.mxu1 %v562_v37  ;;  %1343 = vmatprep.mubr.f32.mxu0 %v533_v38 }
 0x1a5   : > { %v812_v0 = vpop.f32.mrf.mxu0  ;;  %v1037_v46 = vpop.f32.mrf.mxu1  ;;  %2604 = vmatprep.mubr.f32.mxu1 %v569_v40  ;;  %2638 = vmatpush3.msra.mxu1 %v1659_v22 }
 0x1a6   : > { %v3822_v49 = vadd.f32 %v1035_v43, %v811_v44  ;;  %2639 = vmatprep.subr.mxu1 %v1658_v26 }
 0x1a7   : > { %v815_v52 = vpop.f32.mrf.mxu0  ;;  %v1040_v53 = vpop.f32.mrf.mxu1  ;;  %1344 = vmatmul.mubr.f32.gmra.mxu0 %v532_v45  ;;  %2640 = vmatpush3.msra.mxu1 %v1658_v26 }
 0x1a8   : > { %v816_v54 = vadd.f32 %v3785_v56, %v815_v52  ;;  %2605 = vmatmul.mubr.f32.gmra.mxu1 %v576_v47  ;;  %1348 = vmatprep.mubr.f32.mxu0 %v540_v48 }
 0x1a9   : > { %v817_v57 = vpop.f32.mrf.mxu0  ;;  %v1042_v58 = vpop.f32.mrf.mxu1  ;;  %2607 = vmatprep.mubr.f32.mxu1 %v583_v50  ;;  %2641 = vmatprep.subr.mxu1 %v1657_v31 }
 0x1aa   : > { %v3829_v61 = vadd.f32 %v1040_v53, %v816_v54  ;;  %2642 = vmatpush3.msra.mxu1 %v1657_v31 }
 0x1ab   : > { %v820_v1 = vpop.f32.mrf.mxu0  ;;  %v1045_v2 = vpop.f32.mrf.mxu1  ;;  %1349 = vmatmul.mubr.f32.gmra.mxu0 %v539_v55  ;;  %2643 = vmatprep.subr.mxu1 %v1656_v35 }
 0x1ac   : > { %v821_v3 = vadd.f32 %v3785_v56, %v820_v1  ;;  %2608 = vmatmul.mubr.f32.gmra.mxu1 %v590_v59  ;;  %1353 = vmatprep.mubr.f32.mxu0 %v547_v60 }
 0x1ad   : > { %v822_v5 = vpop.f32.mrf.mxu0  ;;  %v1047_v6 = vpop.f32.mrf.mxu1  ;;  %2610 = vmatprep.mubr.f32.mxu1 %v597_v62  ;;  %2644 = vmatpush3.msra.mxu1 %v1656_v35 }
 0x1ae   : > { %v3835_v10 = vadd.f32 %v1045_v2, %v821_v3 }
 0x1af   : > { %v825_v11 = vpop.f32.mrf.mxu0  ;;  %v1050_v12 = vpop.f32.mrf.mxu1  ;;  %1354 = vmatmul.mubr.f32.gmra.mxu0 %v546_v4 }
 0x1b0   : > { %v826_v14 = vadd.f32 %v3785_v56, %v825_v11  ;;  %2611 = vmatmul.mubr.f32.gmra.mxu1 %v604_v8 }
 0x1b1   : > { %v827_v15 = vpop.f32.mrf.mxu0  ;;  %v1052_v16 = vpop.f32.mrf.mxu1 }
 0x1b2   : > { %v3838_v19 = vadd.f32 %v1050_v12, %v826_v14 }
 0x1b3   : > { %v830_v20 = vpop.f32.mrf.mxu0  ;;  %v1055_v21 = vpop.f32.mrf.mxu1 }
 0x1b4   : > { %v831_v23 = vadd.f32 %v3785_v56, %v830_v20 }
 0x1b5   : > { %v832_v24 = vpop.f32.mrf.mxu0  ;;  %v1057_v25 = vpop.f32.mrf.mxu1 }
 0x1b6   : > { %v3841_v27 = vadd.f32 %v1055_v21, %v831_v23 }
 0x1b7   : > { %v835_v29 = vpop.f32.mrf.mxu0  ;;  %v1060_v30 = vpop.f32.mrf.mxu1 }
 0x1b8   : > { %v836_v32 = vadd.f32 %v3785_v56, %v835_v29 }
 0x1b9   : > { %v837_v33 = vpop.f32.mrf.mxu0  ;;  %v1062_v34 = vpop.f32.mrf.mxu1 }
 0x1ba   : > { %v3844_v36 = vadd.f32 %v1060_v30, %v836_v32 }
 0x1bb   : > { %v840_v37 = vpop.f32.mrf.mxu0  ;;  %v1065_v38 = vpop.f32.mrf.mxu1 }
 0x1bc   : > { %v841_v40 = vadd.f32 %v3785_v56, %v840_v37 }
 0x1bd   : > { %v842_v41 = vpop.f32.mrf.mxu0  ;;  %v1067_v42 = vpop.f32.mrf.mxu1 }
 0x1be   : > { %v3847_v43 = vadd.f32 %v1065_v38, %v841_v40 }
 0x1bf   : > { %v845_v44 = vpop.f32.mrf.mxu0  ;;  %v1070_v45 = vpop.f32.mrf.mxu1 }
 0x1c0   : > { %v846_v0 = vadd.f32 %v3785_v56, %v845_v44 }
 0x1c1   : > { %v847_v46 = vpop.f32.mrf.mxu0  ;;  %v1072_v47 = vpop.f32.mrf.mxu1 }
 0x1c2   : > { %v3850_v48 = vadd.f32 %v1070_v45, %v846_v0 }
 0x1c3   : > { %v850_v50 = vpop.f32.mrf.mxu0  ;;  %v1075_v51 = vpop.f32.mrf.mxu1 }
 0x1c4   : > { %v851_v52 = vadd.f32 %v3785_v56, %v850_v50 }
 0x1c5   : > { %v852_v53 = vpop.f32.mrf.mxu0  ;;  %v1077_v54 = vpop.f32.mrf.mxu1 }
 0x1c6   : > { %v3853_v55 = vadd.f32 %v1075_v51, %v851_v52 }
 0x1c7   : > { %v855_v57 = vpop.f32.mrf.mxu0  ;;  %v1080_v58 = vpop.f32.mrf.mxu1 }
 0x1c8   : > { %v856_v59 = vadd.f32 %v3785_v56, %v855_v57 }
 0x1c9   : > { %v857_v60 = vpop.f32.mrf.mxu0  ;;  %v1082_v62 = vpop.f32.mrf.mxu1 }
 0x1ca   : > { %v3856_v63 = vadd.f32 %v1080_v58, %v856_v59 }
 0x1cb   : > { %v860_v1 = vpop.f32.mrf.mxu0  ;;  %v1085_v2 = vpop.f32.mrf.mxu1 }
 0x1cc   : > { %v861_v3 = vadd.f32 %v3785_v56, %v860_v1 }
 0x1cd   : > { %v862_v4 = vpop.f32.mrf.mxu0  ;;  %v1087_v5 = vpop.f32.mrf.mxu1 }
 0x1ce   : > { %v3859_v6 = vadd.f32 %v1085_v2, %v861_v3 }
 0x1cf   : > { %v865_v8 = vpop.f32.mrf.mxu0  ;;  %v1090_v9 = vpop.f32.mrf.mxu1 }
 0x1d0   : > { %v866_v11 = vadd.f32 %v3785_v56, %v865_v8 }
 0x1d1   : > { %v867_v12 = vpop.f32.mrf.mxu0  ;;  %v1092_v13 = vpop.f32.mrf.mxu1 }
 0x1d2   : > { %v3862_v14 = vadd.f32 %v1090_v9, %v866_v11 }
 0x1d3   : > { %v870_v15 = vpop.f32.mrf.mxu0  ;;  %v1095_v16 = vpop.f32.mrf.mxu1 }
 0x1d4   : > { %v871_v18 = vadd.f32 %v3785_v56, %v870_v15 }
 0x1d5   : > { %v872_v20 = vpop.f32.mrf.mxu0  ;;  %v1097_v21 = vpop.f32.mrf.mxu1 }
 0x1d6   : > { %v3865_v22 = vadd.f32 %v1095_v16, %v871_v18 }
 0x1d7   : > { %v875_v23 = vpop.f32.mrf.mxu0  ;;  %v1100_v24 = vpop.f32.mrf.mxu1 }
 0x1d8   : > { %v876_v25 = vadd.f32 %v3785_v56, %v875_v23 }
 0x1d9   : > { %v877_v26 = vpop.f32.mrf.mxu0  ;;  %v1102_v29 = vpop.f32.mrf.mxu1 }
 0x1da   : > { %v3868_v30 = vadd.f32 %v1100_v24, %v876_v25 }
 0x1db   : > { %v880_v31 = vpop.f32.mrf.mxu0  ;;  %v1105_v32 = vpop.f32.mrf.mxu1 }
 0x1dc   : > { %v881_v33 = vadd.f32 %v3785_v56, %v880_v31 }
 0x1dd   : > { %v882_v34 = vpop.f32.mrf.mxu0  ;;  %v1107_v35 = vpop.f32.mrf.mxu1 }
 0x1de   : > { %v3871_v37 = vadd.f32 %v1105_v32, %v881_v33 }
 0x1df   : > { %v885_v38 = vpop.f32.mrf.mxu0  ;;  %v1110_v40 = vpop.f32.mrf.mxu1 }
 0x1e0   : > { %v886_v41 = vadd.f32 %v3785_v56, %v885_v38 }
 0x1e1   : > { %v887_v42 = vpop.f32.mrf.mxu0  ;;  %v1112_v44 = vpop.f32.mrf.mxu1 }
 0x1e2   : > { %v3874_v45 = vadd.f32 %v1110_v40, %v886_v41 }
 0x1e3   : > { %v890_v0 = vpop.f32.mrf.mxu0  ;;  %v1115_v46 = vpop.f32.mrf.mxu1 }
 0x1e4   : > { %v891_v47 = vadd.f32 %v3785_v56, %v890_v0 }
 0x1e5   : > { %v892_v50 = vpop.f32.mrf.mxu0  ;;  %v1117_v51 = vpop.f32.mrf.mxu1 }
 0x1e6   : > { %v3877_v52 = vadd.f32 %v1115_v46, %v891_v47 }
 0x1e7   : > { %v895_v53 = vpop.f32.mrf.mxu0  ;;  %v1120_v54 = vpop.f32.mrf.mxu1 }
 0x1e8   : > { %v896_v57 = vadd.f32 %v3785_v56, %v895_v53 }
 0x1e9   : > { %v897_v58 = vpop.f32.mrf.mxu0  ;;  %v1122_v59 = vpop.f32.mrf.mxu1 }
 0x1ea   : > { %v3880_v60 = vadd.f32 %v1120_v54, %v896_v57 }
 0x1eb   : > { %v900_v62 = vpop.f32.mrf.mxu0  ;;  %v1125_v1 = vpop.f32.mrf.mxu1 }
 0x1ec   : > { %v901_v2 = vadd.f32 %v3785_v56, %v900_v62 }
 0x1ed   : > { %v902_v3 = vpop.f32.mrf.mxu0  ;;  %v1127_v4 = vpop.f32.mrf.mxu1 }
 0x1ee   : > { %v3883_v5 = vadd.f32 %v1125_v1, %v901_v2  ;;  %v1951_v1 = vld [vmem:[#allocation11 + $0x78] sm:$0xff]  ;;  %v1950_v2 = vld [vmem:[#allocation11 + $0x70] sm:$0xff] }
 0x1ef   : > { %v905_v8 = vpop.f32.mrf.mxu0  ;;  %v1130_v9 = vpop.f32.mrf.mxu1  ;;  %2693 = vmatprep.subr.mxu0 %v1951_v1 }
 0x1f0   : > { %v906_v11 = vadd.f32 %v3785_v56, %v905_v8  ;;  %2694 = vmatpush3.msra.mxu0 %v1951_v1  ;;  %v1941_v1 = vld [vmem:[#allocation11 + $0x28] sm:$0xff] }
 0x1f1   : > { %v907_v12 = vpop.f32.mrf.mxu0  ;;  %v1132_v13 = vpop.f32.mrf.mxu1  ;;  %2695 = vmatprep.subr.mxu0 %v1950_v2 }
 0x1f2   : > { %v3886_v15 = vadd.f32 %v1130_v9, %v906_v11  ;;  %v1949_v9 = vld [vmem:[#allocation11 + $0x68] sm:$0xff]  ;;  %2696 = vmatpush3.msra.mxu0 %v1950_v2 }
 0x1f3   : > { %v910_v16 = vpop.f32.mrf.mxu0  ;;  %v1135_v18 = vpop.f32.mrf.mxu1  ;;  %2697 = vmatprep.subr.mxu0 %v1949_v9 }
 0x1f4   : > { %v911_v20 = vadd.f32 %v3785_v56, %v910_v16  ;;  %v1948_v16 = vld [vmem:[#allocation11 + $0x60] sm:$0xff]  ;;  %2698 = vmatpush3.msra.mxu0 %v1949_v9 }
 0x1f5   : > { %v912_v21 = vpop.f32.mrf.mxu0  ;;  %v1137_v23 = vpop.f32.mrf.mxu1  ;;  %2699 = vmatprep.subr.mxu0 %v1948_v16 }
 0x1f6   : > { %v3889_v24 = vadd.f32 %v1135_v18, %v911_v20  ;;  %v1947_v23 = vld [vmem:[#allocation11 + $0x58] sm:$0xff]  ;;  %2700 = vmatpush3.msra.mxu0 %v1948_v16 }
 0x1f7   : > { %v915_v25 = vpop.f32.mrf.mxu0  ;;  %v1140_v26 = vpop.f32.mrf.mxu1  ;;  %2701 = vmatprep.subr.mxu0 %v1947_v23 }
 0x1f8   : > { %v916_v29 = vadd.f32 %v3785_v56, %v915_v25  ;;  %2702 = vmatpush3.msra.mxu0 %v1947_v23 }
 0x1f9   : > { %v917_v31 = vpop.f32.mrf.mxu0  ;;  %v1142_v32 = vpop.f32.mrf.mxu1 }
 0x1fa   : > { %v3892_v33 = vadd.f32 %v1140_v26, %v916_v29  ;;  %v1946_v31 = vld [vmem:[#allocation11 + $0x50] sm:$0xff] }
 0x1fb   : > { %v920_v34 = vpop.f32.mrf.mxu0  ;;  %v1145_v35 = vpop.f32.mrf.mxu1  ;;  %2703 = vmatprep.subr.mxu0 %v1946_v31 }
 0x1fc   : > { %v921_v38 = vadd.f32 %v3785_v56, %v920_v34  ;;  %2704 = vmatpush3.msra.mxu0 %v1946_v31 }
 0x1fd   : > { %v922_v40 = vpop.f32.mrf.mxu0  ;;  %v1147_v41 = vpop.f32.mrf.mxu1 }
 0x1fe   : > { %v3895_v42 = vadd.f32 %v1145_v35, %v921_v38  ;;  %v1945_v38 = vld [vmem:[#allocation11 + $0x48] sm:$0xff] }
 0x1ff   : > { %v925_v44 = vpop.f32.mrf.mxu0  ;;  %v1150_v0 = vpop.f32.mrf.mxu1  ;;  %2705 = vmatprep.subr.mxu0 %v1945_v38 }
 0x200   : > { %v926_v46 = vadd.f32 %v3785_v56, %v925_v44  ;;  %2706 = vmatpush3.msra.mxu0 %v1945_v38 }
 0x201   : > { %v927_v47 = vpop.f32.mrf.mxu0  ;;  %v1152_v50 = vpop.f32.mrf.mxu1 }
 0x202   : > { %v3898_v51 = vadd.f32 %v1150_v0, %v926_v46  ;;  %v1944_v0 = vld [vmem:[#allocation11 + $0x40] sm:$0xff] }
 0x203   : > { %v930_v53 = vpop.f32.mrf.mxu0  ;;  %v1155_v54 = vpop.f32.mrf.mxu1  ;;  %2707 = vmatprep.subr.mxu0 %v1944_v0 }
 0x204   : > { %v931_v57 = vadd.f32 %v3785_v56, %v930_v53  ;;  %v1943_v53 = vld [vmem:[#allocation11 + $0x38] sm:$0xff]  ;;  %2708 = vmatpush3.msra.mxu0 %v1944_v0 }
 0x205   : > { %v932_v58 = vpop.f32.mrf.mxu0  ;;  %v1157_v59 = vpop.f32.mrf.mxu1  ;;  %2709 = vmatprep.subr.mxu0 %v1943_v53 }
 0x206   : > { %v3901_v62 = vadd.f32 %v1155_v54, %v931_v57  ;;  %2710 = vmatpush3.msra.mxu0 %v1943_v53 }
 0x207   : > { %v935_v3 = vpop.f32.mrf.mxu0  ;;  %v1160_v4 = vpop.f32.mrf.mxu1 }
 0x208   : > { %v936_v8 = vadd.f32 %v3785_v56, %v935_v3 }
 0x209   : > { %v937_v11 = vpop.f32.mrf.mxu0  ;;  %v1162_v12 = vpop.f32.mrf.mxu1 }
 0x20a   : > { %v3904_v13 = vadd.f32 %v1160_v4, %v936_v8  ;;  %v1939_v11 = vld [vmem:[#allocation11 + $0x18] sm:$0xff] }
 0x20b   : > { %v940_v18 = vpop.f32.mrf.mxu0  ;;  %v1165_v20 = vpop.f32.mrf.mxu1 }
 0x20c   : > { %v941_v21 = vadd.f32 %v3785_v56, %v940_v18 }
 0x20d   : > { %v942_v25 = vpop.f32.mrf.mxu0  ;;  %v1167_v26 = vpop.f32.mrf.mxu1 }
 0x20e   : > { %v3907_v29 = vadd.f32 %v1165_v20, %v941_v21 }
 0x20f   : > { %v945_v32 = vpop.f32.mrf.mxu0  ;;  %v1170_v34 = vpop.f32.mrf.mxu1 }
 0x210   : > { %v946_v35 = vadd.f32 %v3785_v56, %v945_v32  ;;  %v1942_v56 = vld [vmem:[#allocation11 + $0x30] sm:$0xff] }
 0x211   : > { %v947_v40 = vpop.f32.mrf.mxu0  ;;  %v1172_v41 = vpop.f32.mrf.mxu1  ;;  %2711 = vmatprep.subr.mxu0 %v1942_v56 }
 0x212   : > { %v1171_v44 = vadd.f32 %v1170_v34, %v946_v35  ;;  %2712 = vmatpush3.msra.mxu0 %v1942_v56 }
 0x213   : > { %v1240_v46 = vpop.f32.mrf.mxu0  ;;  %v1360_v47 = vpop.f32.mrf.mxu1  ;;  %2713 = vmatprep.subr.mxu0 %v1941_v1 }
 0x214   : > { %v3911_v50 = vadd.f32 %v1360_v47, %v3889_v24  ;;  %v1940_v24 = vld [vmem:[#allocation11 + $0x20] sm:$0xff]  ;;  %2714 = vmatpush3.msra.mxu0 %v1941_v1 }
 0x215   : > { %v1242_v54 = vpop.f32.mrf.mxu0  ;;  %v1362_v57 = vpop.f32.mrf.mxu1  ;;  %2715 = vmatprep.subr.mxu0 %v1940_v24 }
 0x216   : > { %2716 = vmatpush3.msra.mxu0 %v1940_v24 }
 0x217   : > { %v1245_v58 = vpop.f32.mrf.mxu0  ;;  %2717 = vmatprep.subr.mxu0 %v1939_v11 }
 0x218   : > { %v1365_v59 = vpop.f32.mrf.mxu1  ;;  %2718 = vmatpush3.msra.mxu0 %v1939_v11  ;;  %v1246_v24 = vadd.f32 %v1245_v58, %v3801_v17 }
 0x219   : > { %v3914_v2 = vadd.f32 %v1365_v59, %v3892_v33  ;;  %v1247_v3 = vpop.f32.mrf.mxu0 }
 0x21a   : > { %v1367_v4 = vpop.f32.mrf.mxu1 }
 0x21b   : > { %v1250_v8 = vpop.f32.mrf.mxu0 }
 0x21c   : > { %v1370_v9 = vpop.f32.mrf.mxu1 }
 0x21d   : > { %v3917_v12 = vadd.f32 %v1370_v9, %v3895_v42  ;;  %v1252_v16 = vpop.f32.mrf.mxu0  ;;  %v1241_v9 = vadd.f32 %v1240_v46, %v3794_v7 }
 0x21e   : > { %v1372_v18 = vpop.f32.mrf.mxu1 }
 0x21f   : > { %v1255_v20 = vpop.f32.mrf.mxu0 }
 0x220   : > { %v1375_v33 = vpop.f32.mrf.mxu1 }
 0x221   : > { %v3920_v21 = vadd.f32 %v1375_v33, %v3898_v51  ;;  %v1257_v23 = vpop.f32.mrf.mxu0 }
 0x222   : > { %v1377_v25 = vpop.f32.mrf.mxu1  ;;  %v1256_v23 = vadd.f32 %v1255_v20, %v3815_v39 }
 0x223   : > { %v1260_v26 = vpop.f32.mrf.mxu0 }
 0x224   : > { %v1380_v31 = vpop.f32.mrf.mxu1  ;;  %v1261_v58 = vadd.f32 %v1260_v26, %v3822_v49 }
 0x225   : > { %v3923_v32 = vadd.f32 %v1380_v31, %v3901_v62  ;;  %v1262_v42 = vpop.f32.mrf.mxu0  ;;  %v1251_v31 = vadd.f32 %v1250_v8, %v3808_v28 }
 0x226   : > { %v1382_v34 = vpop.f32.mrf.mxu1 }
 0x227   : > { %v1265_v35 = vpop.f32.mrf.mxu0 }
 0x228   : > { %v1385_v38 = vpop.f32.mrf.mxu1  ;;  %v1266_v7 = vadd.f32 %v1265_v35, %v3829_v61 }
 0x229   : > { %v3926_v40 = vadd.f32 %v1385_v38, %v3904_v13  ;;  %v1267_v41 = vpop.f32.mrf.mxu0 }
 0x22a   : > { %v1387_v0 = vpop.f32.mrf.mxu1 }
 0x22b   : > { %v1270_v47 = vpop.f32.mrf.mxu0 }
 0x22c   : > { %v1390_v53 = vpop.f32.mrf.mxu1 }
 0x22d   : > { %v3929_v51 = vadd.f32 %v1390_v53, %v3907_v29  ;;  %v1272_v54 = vpop.f32.mrf.mxu0 }
 0x22e   : > { %v1392_v57 = vpop.f32.mrf.mxu1 }
 0x22f   : > { %v1275_v56 = vpop.f32.mrf.mxu0 }
 0x230   : > { %v1395_v59 = vpop.f32.mrf.mxu1 }
 0x231   : > { %v3931_v62 = vadd.f32 %v1395_v59, %v1171_v44  ;;  %v1277_v1 = vpop.f32.mrf.mxu0  ;;  %v1276_v59 = vadd.f32 %v1275_v56, %v3838_v19 }
 0x232   : > { %v1397_v3 = vpop.f32.mrf.mxu1 }
 0x233   : > { %v1280_v4 = vpop.f32.mrf.mxu0  ;;  %v1271_v3 = vadd.f32 %v1270_v47, %v3835_v10 }
 0x234   : > { %v2567_v13 = vpop.f32.mrf.mxu1 }
 0x235   : > { %v1282_v11 = vpop.f32.mrf.mxu0  ;;  %v1471_v16 = vadd.f32 %v2567_v13, %v1246_v24 }
 0x236   : > { %v1465_v18 = vpop.f32.mrf.mxu1 }
 0x237   : > { %v1466_v33 = vadd.f32 %v1465_v18, %v1241_v9  ;;  %v1285_v29 = vpop.f32.mrf.mxu0  ;;  %v1625_v34 = vmax.f32 %v1471_v16, 0.0  ;;  %v1281_v18 = vadd.f32 %v1280_v4, %v3841_v27 }
 0x238   : > { %v2570_v25 = vpop.f32.mrf.mxu1  ;;  %v1286_v11 = vadd.f32 %v1285_v29, %v3844_v36 }
 0x239   : > { %v1624_v44 = vmax.f32 %v1466_v33, 0.0  ;;  %v1287_v42 = vpop.f32.mrf.mxu0  ;;  %v1481_v38 = vadd.f32 %v2570_v25, %v1256_v23 }
 0x23a   : > { %v1475_v41 = vpop.f32.mrf.mxu1 }
 0x23b   : > { %v1476_v0 = vadd.f32 %v1475_v41, %v1251_v31  ;;  %2645 = vmatprep.mubr.f32.mxu1 %v1624_v44  ;;  %v1290_v17 = vpop.f32.mrf.mxu0  ;;  %v1627_v39 = vmax.f32 %v1481_v38, 0.0 }
 0x23c   : > { %v2573_v46 = vpop.f32.mrf.mxu1  ;;  %2646 = vmatmul.mubr.f32.vlgmr.msra.gmra.mxu1 %v1625_v34  ;;  %v1291_v42 = vadd.f32 %v1290_v17, %v3847_v43 }
 0x23d   : > { %v1626_v53 = vmax.f32 %v1476_v0, 0.0  ;;  %v1292_v54 = vpop.f32.mrf.mxu0  ;;  %v1491_v20 = vadd.f32 %v2573_v46, %v1266_v7 }
 0x23e   : > { %v1485_v57 = vpop.f32.mrf.mxu1 }
 0x23f   : > { %v1486_v28 = vadd.f32 %v1485_v57, %v1261_v58  ;;  %2648 = vmatprep.mubr.f32.mxu1 %v1626_v53  ;;  %v1295_v8 = vpop.f32.mrf.mxu0  ;;  %v1629_v35 = vmax.f32 %v1491_v20, 0.0 }
 0x240   : > { %v2576_v1 = vpop.f32.mrf.mxu1  ;;  %2649 = vmatmul.mubr.f32.gmra.mxu1 %v1627_v39  ;;  %v1296_v31 = vadd.f32 %v1295_v8, %v3850_v48 }
 0x241   : > { %v1628_v24 = vmax.f32 %v1486_v28, 0.0  ;;  %v1297_v61 = vpop.f32.mrf.mxu0  ;;  %v1501_v13 = vadd.f32 %v2576_v1, %v1276_v59 }
 0x242   : > { %v1495_v9 = vpop.f32.mrf.mxu1 }
 0x243   : > { %v1496_v49 = vadd.f32 %v1495_v9, %v1271_v3  ;;  %2651 = vmatprep.mubr.f32.mxu1 %v1628_v24  ;;  %v1300_v26 = vpop.f32.mrf.mxu0  ;;  %v1631_v56 = vmax.f32 %v1501_v13, 0.0 }
 0x244   : > { %v2579_v16 = vpop.f32.mrf.mxu1  ;;  %2652 = vmatmul.mubr.f32.gmra.mxu1 %v1629_v35  ;;  %v1301_v46 = vadd.f32 %v1300_v26, %v3853_v55 }
 0x245   : > { %v1630_v33 = vmax.f32 %v1496_v49, 0.0  ;;  %v1302_v19 = vpop.f32.mrf.mxu0  ;;  %v1511_v23 = vadd.f32 %v2579_v16, %v1286_v11 }
 0x246   : > { %v1505_v25 = vpop.f32.mrf.mxu1 }
 0x247   : > { %v1506_v10 = vadd.f32 %v1505_v25, %v1281_v18  ;;  %2654 = vmatprep.mubr.f32.mxu1 %v1630_v33  ;;  %v1305_v47 = vpop.f32.mrf.mxu0  ;;  %v1633_v29 = vmax.f32 %v1511_v23, 0.0 }
 0x248   : > { %v2582_v44 = vpop.f32.mrf.mxu1  ;;  %2655 = vmatmul.mubr.f32.gmra.mxu1 %v1631_v56  ;;  %v1306_v0 = vadd.f32 %v1305_v47, %v3856_v63 }
 0x249   : > { %v1632_v34 = vmax.f32 %v1506_v10, 0.0  ;;  %v1307_v36 = vpop.f32.mrf.mxu0  ;;  %v1521_v38 = vadd.f32 %v2582_v44, %v1296_v31 }
 0x24a   : > { %v1515_v41 = vpop.f32.mrf.mxu1 }
 0x24b   : > { %v1516_v27 = vadd.f32 %v1515_v41, %v1291_v42  ;;  %2657 = vmatprep.mubr.f32.mxu1 %v1632_v34  ;;  %v1310_v4 = vpop.f32.mrf.mxu0  ;;  %v1635_v53 = vmax.f32 %v1521_v38, 0.0 }
 0x24c   : > { %v2585_v7 = vpop.f32.mrf.mxu1  ;;  %2658 = vmatmul.mubr.f32.gmra.mxu1 %v1633_v29  ;;  %v1311_v28 = vadd.f32 %v1310_v4, %v3859_v6 }
 0x24d   : > { %v1634_v58 = vmax.f32 %v1516_v27, 0.0  ;;  %v1312_v48 = vpop.f32.mrf.mxu0  ;;  %v1531_v54 = vadd.f32 %v2585_v7, %v1306_v0 }
 0x24e   : > { %v1525_v39 = vpop.f32.mrf.mxu1 }
 0x24f   : > { %v1526_v43 = vadd.f32 %v1525_v39, %v1301_v46  ;;  %2660 = vmatprep.mubr.f32.mxu1 %v1634_v58  ;;  %v1315_v17 = vpop.f32.mrf.mxu0  ;;  %v1637_v59 = vmax.f32 %v1531_v54, 0.0 }
 0x250   : > { %v1316_v20 = vadd.f32 %v1315_v17, %v3862_v14  ;;  %v2588_v57 = vpop.f32.mrf.mxu1  ;;  %2661 = vmatmul.mubr.f32.gmra.mxu1 %v1635_v53 }
 0x251   : > { %v1636_v8 = vmax.f32 %v1526_v43, 0.0  ;;  %v1317_v63 = vpop.f32.mrf.mxu0 }
 0x252   : > { %v1541_v1 = vadd.f32 %v2588_v57, %v1316_v20  ;;  %v1535_v3 = vpop.f32.mrf.mxu1 }
 0x253   : > { %v1536_v55 = vadd.f32 %v1535_v3, %v1311_v28  ;;  %2663 = vmatprep.mubr.f32.mxu1 %v1636_v8  ;;  %v1320_v24 = vpop.f32.mrf.mxu0 }
 0x254   : > { %v1639_v61 = vmax.f32 %v1541_v1, 0.0  ;;  %v1321_v35 = vadd.f32 %v1320_v24, %v3865_v22  ;;  %v2591_v13 = vpop.f32.mrf.mxu1  ;;  %2664 = vmatmul.mubr.f32.gmra.mxu1 %v1637_v59 }
 0x255   : > { %v1638_v9 = vmax.f32 %v1536_v55, 0.0  ;;  %v1322_v49 = vpop.f32.mrf.mxu0 }
 0x256   : > { %v1545_v14 = vpop.f32.mrf.mxu1 }
 0x257   : > { %v1546_v26 = vadd.f32 %v1545_v14, %v1321_v35  ;;  %2666 = vmatprep.mubr.f32.mxu1 %v1638_v9  ;;  %v1325_v11 = vpop.f32.mrf.mxu0 }
 0x258   : > { %v1326_v6 = vadd.f32 %v1325_v11, %v3868_v30  ;;  %v2594_v16 = vpop.f32.mrf.mxu1  ;;  %2667 = vmatmul.mubr.f32.gmra.mxu1 %v1639_v61 }
 0x259   : > { %v1640_v18 = vmax.f32 %v1546_v26, 0.0  ;;  %v1327_v33 = vpop.f32.mrf.mxu0 }
 0x25a   : > { %v1551_v19 = vadd.f32 %v2591_v13, %v1326_v6  ;;  %v1555_v56 = vpop.f32.mrf.mxu1  ;;  %v1938_v33 = vld [vmem:[#allocation11 + $0x10] sm:$0xff] }
 0x25b   : > { %2669 = vmatprep.mubr.f32.mxu1 %v1640_v18  ;;  %v1330_v23 = vpop.f32.mrf.mxu0  ;;  %2719 = vmatprep.subr.mxu0 %v1938_v33 }
 0x25c   : > { %v1641_v25 = vmax.f32 %v1551_v19, 0.0  ;;  %v1331_v22 = vadd.f32 %v1330_v23, %v3871_v37  ;;  %v2597_v10 = vpop.f32.mrf.mxu1  ;;  %2720 = vmatpush3.msra.mxu0 %v1938_v33 }
 0x25d   : > { %v1332_v47 = vpop.f32.mrf.mxu0 }
 0x25e   : > { %v1556_v31 = vadd.f32 %v1555_v56, %v1331_v22  ;;  %v1565_v44 = vpop.f32.mrf.mxu1  ;;  %2670 = vmatmul.mubr.f32.gmra.mxu1 %v1641_v25  ;;  %v1936_v56 = vld [vmem:[#allocation11] sm:$0xff] }
 0x25f   : > { %v1335_v42 = vpop.f32.mrf.mxu0 }
 0x260   : > { %v1642_v34 = vmax.f32 %v1556_v31, 0.0  ;;  %v1336_v30 = vadd.f32 %v1335_v42, %v3874_v45  ;;  %v2600_v36 = vpop.f32.mrf.mxu1 }
 0x261   : > { %v1337_v29 = vpop.f32.mrf.mxu0 }
 0x262   : > { %v1561_v38 = vadd.f32 %v2594_v16, %v1336_v30  ;;  %v1575_v41 = vpop.f32.mrf.mxu1  ;;  %2672 = vmatprep.mubr.f32.mxu1 %v1642_v34 }
 0x263   : > { %v1340_v27 = vpop.f32.mrf.mxu0 }
 0x264   : > { %v1643_v4 = vmax.f32 %v1561_v38, 0.0  ;;  %v1341_v0 = vadd.f32 %v1340_v27, %v3877_v52  ;;  %v2603_v7 = vpop.f32.mrf.mxu1 }
 0x265   : > { %v1342_v37 = vpop.f32.mrf.mxu0  ;;  %v1591_v35 = vadd.f32 %v2603_v7, %v3914_v2 }
 0x266   : > { %v1566_v46 = vadd.f32 %v1565_v44, %v1341_v0  ;;  %v1585_v58 = vpop.f32.mrf.mxu1  ;;  %2673 = vmatmul.mubr.f32.gmra.mxu1 %v1643_v4 }
 0x267   : > { %v1345_v48 = vpop.f32.mrf.mxu0  ;;  %v1586_v55 = vadd.f32 %v1585_v58, %v3911_v50  ;;  %v1649_v14 = vmax.f32 %v1591_v35, 0.0 }
 0x268   : > { %v1644_v53 = vmax.f32 %v1566_v46, 0.0  ;;  %v1346_v54 = vadd.f32 %v1345_v48, %v3880_v60  ;;  %v2606_v39 = vpop.f32.mrf.mxu1 }
 0x269   : > { %v1347_v45 = vpop.f32.mrf.mxu0  ;;  %v1648_v9 = vmax.f32 %v1586_v55, 0.0  ;;  %v1601_v26 = vadd.f32 %v2606_v39, %v3920_v21 }
 0x26a   : > { %v1571_v43 = vadd.f32 %v2597_v10, %v1346_v54  ;;  %v1595_v17 = vpop.f32.mrf.mxu1  ;;  %2675 = vmatprep.mubr.f32.mxu1 %v1644_v53 }
 0x26b   : > { %v1350_v20 = vpop.f32.mrf.mxu0  ;;  %v1651_v6 = vmax.f32 %v1601_v26, 0.0 }
 0x26c   : > { %v1645_v57 = vmax.f32 %v1571_v43, 0.0  ;;  %v1351_v28 = vadd.f32 %v1350_v20, %v3883_v5  ;;  %v2609_v63 = vpop.f32.mrf.mxu1  ;;  %v1596_v5 = vadd.f32 %v1595_v17, %v3917_v12  ;;  %v1937_v12 = vld [vmem:[#allocation11 + $0x8] sm:$0xff] }
 0x26d   : > { %v1352_v8 = vpop.f32.mrf.mxu0  ;;  %v1611_v16 = vadd.f32 %v2609_v63, %v3926_v40  ;;  %2721 = vmatprep.subr.mxu0 %v1937_v12 }
 0x26e   : > { %v1576_v52 = vadd.f32 %v1575_v41, %v1351_v28  ;;  %2676 = vmatmul.mubr.f32.gmra.mxu1 %v1645_v57  ;;  %v1605_v24 = vpop.f32.mrf.mxu1  ;;  %v1650_v11 = vmax.f32 %v1596_v5, 0.0  ;;  %2722 = vmatpush3.msra.mxu0 %v1937_v12 }
 0x26f   : > { %v1355_v59 = vpop.f32.mrf.mxu0  ;;  %v1653_v19 = vmax.f32 %v1611_v16, 0.0  ;;  %2723 = vmatprep.subr.mxu0 %v1936_v56 }
 0x270   : > { %v1646_v1 = vmax.f32 %v1576_v52, 0.0  ;;  %v1356_v3 = vadd.f32 %v1355_v59, %v3886_v15  ;;  %v2612_v49 = vpop.f32.mrf.mxu1  ;;  %v1606_v15 = vadd.f32 %v1605_v24, %v3923_v32  ;;  %2724 = vmatpush3.msra.mxu0 %v1936_v56 }
 0x271   : > { %v1357_v60 = vpop.f32.mrf.mxu0  ;;  %v1621_v21 = vadd.f32 %v2612_v49, %v3931_v62 }
 0x272   : > { %v1581_v61 = vadd.f32 %v2600_v36, %v1356_v3  ;;  %2678 = vmatprep.mubr.f32.mxu1 %v1646_v1  ;;  %v1615_v50 = vpop.f32.mrf.mxu1  ;;  %v1652_v2 = vmax.f32 %v1606_v15, 0.0 }
 0x273   : > { %v1616_v18 = vadd.f32 %v1615_v50, %v3929_v51  ;;  %v1655_v40 = vmax.f32 %v1621_v21, 0.0  ;;  %v3965_v51 = vld [vmem:[#allocation10] ss:$0 sm:$0xff] }
 0x274   : > { %v1647_v13 = vmax.f32 %v1581_v61, 0.0 }
 0x275   : > { %v1654_v32 = vmax.f32 %v1616_v18, 0.0 }
 0x276   : > { %2679 = vmatmul.mubr.f32.gmra.mxu1 %v1647_v13 }
 0x277   : > { %2681 = vmatprep.mubr.f32.mxu1 %v1648_v9 }
 0x27a   : > { %2682 = vmatmul.mubr.f32.gmra.mxu1 %v1649_v14 }
 0x27b   : > { %2684 = vmatprep.mubr.f32.mxu1 %v1650_v11 }
 0x27e   : > { %2685 = vmatmul.mubr.f32.gmra.mxu1 %v1651_v6 }
 0x27f   : > { %2687 = vmatprep.mubr.f32.mxu1 %v1652_v2 }
 0x282   : > { %2688 = vmatmul.mubr.f32.gmra.mxu1 %v1653_v19 }
 0x283   : > { %2690 = vmatprep.mubr.f32.mxu1 %v1654_v32 }
 0x286   : > { %2691 = vmatmul.mubr.f32.gmra.mxu1 %v1655_v40 }
 0x2fc   : > { %v2647_v23 = vpop.f32.mrf.mxu1 }
 0x2fd   : > { %v1751_v25 = vadd.f32 %v2647_v23, %v3965_v51 }
 0x2fe   : > { %v1745_v22 = vpop.f32.mrf.mxu1 }
 0x2ff   : > { %v1746_v10 = vadd.f32 %v3965_v51, %v1745_v22  ;;  %v1905_v31 = vmax.f32 %v1751_v25, 0.0 }
 0x300   : > { %v2650_v47 = vpop.f32.mrf.mxu1 }
 0x301   : > { %v1904_v62 = vmax.f32 %v1746_v10, 0.0  ;;  %v1761_v44 = vadd.f32 %v2650_v47, %v3965_v51 }
 0x302   : > { %v1755_v42 = vpop.f32.mrf.mxu1 }
 0x303   : > { %v1756_v34 = vadd.f32 %v3965_v51, %v1755_v42  ;;  %2725 = vmatprep.mubr.f32.mxu0 %v1904_v62  ;;  %v1907_v29 = vmax.f32 %v1761_v44, 0.0 }
 0x304   : > { %v2653_v30 = vpop.f32.mrf.mxu1  ;;  %2726 = vmatmul.mubr.f32.vlgmr.msra.gmra.mxu0 %v1905_v31 }
 0x305   : > { %v1906_v36 = vmax.f32 %v1756_v34, 0.0  ;;  %v1771_v38 = vadd.f32 %v2653_v30, %v3965_v51 }
 0x306   : > { %v1765_v41 = vpop.f32.mrf.mxu1 }
 0x307   : > { %v1766_v27 = vadd.f32 %v3965_v51, %v1765_v41  ;;  %2728 = vmatprep.mubr.f32.mxu0 %v1906_v36  ;;  %v1909_v7 = vmax.f32 %v1771_v38, 0.0 }
 0x308   : > { %v2656_v4 = vpop.f32.mrf.mxu1  ;;  %2729 = vmatmul.mubr.f32.gmra.mxu0 %v1907_v29 }
 0x309   : > { %v1908_v0 = vmax.f32 %v1766_v27, 0.0  ;;  %v1781_v37 = vadd.f32 %v2656_v4, %v3965_v51 }
 0x30a   : > { %v1775_v46 = vpop.f32.mrf.mxu1 }
 0x30b   : > { %v1776_v58 = vadd.f32 %v3965_v51, %v1775_v46  ;;  %2731 = vmatprep.mubr.f32.mxu0 %v1908_v0  ;;  %v1911_v54 = vmax.f32 %v1781_v37, 0.0 }
 0x30c   : > { %v2659_v48 = vpop.f32.mrf.mxu1  ;;  %2732 = vmatmul.mubr.f32.gmra.mxu0 %v1909_v7 }
 0x30d   : > { %v1910_v53 = vmax.f32 %v1776_v58, 0.0  ;;  %v1791_v39 = vadd.f32 %v2659_v48, %v3965_v51 }
 0x30e   : > { %v1785_v45 = vpop.f32.mrf.mxu1 }
 0x30f   : > { %v1786_v43 = vadd.f32 %v3965_v51, %v1785_v45  ;;  %2734 = vmatprep.mubr.f32.mxu0 %v1910_v53  ;;  %v1913_v57 = vmax.f32 %v1791_v39, 0.0 }
 0x310   : > { %v2662_v17 = vpop.f32.mrf.mxu1  ;;  %2735 = vmatmul.mubr.f32.gmra.mxu0 %v1911_v54 }
 0x311   : > { %v1912_v20 = vmax.f32 %v1786_v43, 0.0  ;;  %v1801_v28 = vadd.f32 %v2662_v17, %v3965_v51 }
 0x312   : > { %v1795_v8 = vpop.f32.mrf.mxu1 }
 0x313   : > { %v1796_v52 = vadd.f32 %v3965_v51, %v1795_v8  ;;  %2737 = vmatprep.mubr.f32.mxu0 %v1912_v20  ;;  %v1915_v1 = vmax.f32 %v1801_v28, 0.0 }
 0x314   : > { %v2665_v63 = vpop.f32.mrf.mxu1  ;;  %2738 = vmatmul.mubr.f32.gmra.mxu0 %v1913_v57 }
 0x315   : > { %v1914_v59 = vmax.f32 %v1796_v52, 0.0  ;;  %v1811_v3 = vadd.f32 %v2665_v63, %v3965_v51  ;;  %v4000_v52 = vld [vmem:[#allocation13] ss:$0 sm:$0xff] }
 0x316   : > { %v1805_v55 = vpop.f32.mrf.mxu1 }
 0x317   : > { %v1806_v60 = vadd.f32 %v3965_v51, %v1805_v55  ;;  %2740 = vmatprep.mubr.f32.mxu0 %v1914_v59  ;;  %v1917_v35 = vmax.f32 %v1811_v3, 0.0 }
 0x318   : > { %v2668_v24 = vpop.f32.mrf.mxu1  ;;  %2741 = vmatmul.mubr.f32.gmra.mxu0 %v1915_v1 }
 0x319   : > { %v1916_v61 = vmax.f32 %v1806_v60, 0.0  ;;  %v1821_v13 = vadd.f32 %v2668_v24, %v3965_v51 }
 0x31a   : > { %v1815_v9 = vpop.f32.mrf.mxu1 }
 0x31b   : > { %v1816_v5 = vadd.f32 %v3965_v51, %v1815_v9  ;;  %2743 = vmatprep.mubr.f32.mxu0 %v1916_v61  ;;  %v1919_v14 = vmax.f32 %v1821_v13, 0.0 }
 0x31c   : > { %2744 = vmatmul.mubr.f32.gmra.mxu0 %v1917_v35 }
 0x31d   : > { %v1918_v49 = vmax.f32 %v1816_v5, 0.0 }
 0x31e   : > { %v2671_v26 = vpop.f32.mrf.mxu1 }
 0x31f   : > { %2746 = vmatprep.mubr.f32.mxu0 %v1918_v49  ;;  %v1831_v11 = vadd.f32 %v2671_v26, %v3965_v51 }
 0x320   : > { %2747 = vmatmul.mubr.f32.gmra.mxu0 %v1919_v14  ;;  %v1825_v15 = vpop.f32.mrf.mxu1 }
 0x321   : > { %v1826_v50 = vadd.f32 %v3965_v51, %v1825_v15  ;;  %v1921_v16 = vmax.f32 %v1831_v11, 0.0 }
 0x323   : > { %v1920_v6 = vmax.f32 %v1826_v50, 0.0 }
 0x325   : > { %2749 = vmatprep.mubr.f32.mxu0 %v1920_v6 }
 0x326   : > { %v2674_v2 = vpop.f32.mrf.mxu1  ;;  %2750 = vmatmul.mubr.f32.gmra.mxu0 %v1921_v16 }
 0x327   : > { %v1841_v18 = vadd.f32 %v2674_v2, %v3965_v51 }
 0x328   : > { %v1835_v33 = vpop.f32.mrf.mxu1 }
 0x329   : > { %v1836_v12 = vadd.f32 %v3965_v51, %v1835_v33  ;;  %v1923_v21 = vmax.f32 %v1841_v18, 0.0 }
 0x32b   : > { %v1922_v19 = vmax.f32 %v1836_v12, 0.0 }
 0x32d   : > { %2752 = vmatprep.mubr.f32.mxu0 %v1922_v19 }
 0x32e   : > { %v2677_v32 = vpop.f32.mrf.mxu1  ;;  %2753 = vmatmul.mubr.f32.gmra.mxu0 %v1923_v21 }
 0x32f   : > { %v1851_v56 = vadd.f32 %v2677_v32, %v3965_v51 }
 0x330   : > { %v1845_v40 = vpop.f32.mrf.mxu1 }
 0x331   : > { %v1846_v23 = vadd.f32 %v3965_v51, %v1845_v40  ;;  %v1925_v22 = vmax.f32 %v1851_v56, 0.0 }
 0x333   : > { %v1924_v25 = vmax.f32 %v1846_v23, 0.0 }
 0x335   : > { %2755 = vmatprep.mubr.f32.mxu0 %v1924_v25 }
 0x336   : > { %v2680_v10 = vpop.f32.mrf.mxu1  ;;  %2756 = vmatmul.mubr.f32.gmra.mxu0 %v1925_v22 }
 0x337   : > { %v1861_v47 = vadd.f32 %v2680_v10, %v3965_v51 }
 0x338   : > { %v1855_v62 = vpop.f32.mrf.mxu1 }
 0x339   : > { %v1856_v31 = vadd.f32 %v3965_v51, %v1855_v62  ;;  %v1927_v34 = vmax.f32 %v1861_v47, 0.0 }
 0x33a   : > { %v2683_v44 = vpop.f32.mrf.mxu1 }
 0x33b   : > { %v1926_v42 = vmax.f32 %v1856_v31, 0.0  ;;  %v1871_v30 = vadd.f32 %v2683_v44, %v3965_v51 }
 0x33c   : > { %v1865_v36 = vpop.f32.mrf.mxu1 }
 0x33d   : > { %v1866_v29 = vadd.f32 %v3965_v51, %v1865_v36  ;;  %2758 = vmatprep.mubr.f32.mxu0 %v1926_v42  ;;  %v1929_v27 = vmax.f32 %v1871_v30, 0.0 }
 0x33e   : > { %v2686_v38 = vpop.f32.mrf.mxu1  ;;  %2759 = vmatmul.mubr.f32.gmra.mxu0 %v1927_v34 }
 0x33f   : > { %v1928_v41 = vmax.f32 %v1866_v29, 0.0  ;;  %v1881_v4 = vadd.f32 %v2686_v38, %v3965_v51 }
 0x340   : > { %v1875_v0 = vpop.f32.mrf.mxu1 }
 0x341   : > { %v1876_v7 = vadd.f32 %v3965_v51, %v1875_v0  ;;  %2761 = vmatprep.mubr.f32.mxu0 %v1928_v41  ;;  %v1931_v58 = vmax.f32 %v1881_v4, 0.0 }
 0x342   : > { %v2689_v37 = vpop.f32.mrf.mxu1  ;;  %2762 = vmatmul.mubr.f32.gmra.mxu0 %v1929_v27 }
 0x343   : > { %v1930_v46 = vmax.f32 %v1876_v7, 0.0  ;;  %v1891_v48 = vadd.f32 %v2689_v37, %v3965_v51 }
 0x344   : > { %v1885_v53 = vpop.f32.mrf.mxu1 }
 0x345   : > { %v1886_v54 = vadd.f32 %v3965_v51, %v1885_v53  ;;  %2764 = vmatprep.mubr.f32.mxu0 %v1930_v46  ;;  %v1933_v43 = vmax.f32 %v1891_v48, 0.0 }
 0x346   : > { %v2692_v39 = vpop.f32.mrf.mxu1  ;;  %2765 = vmatmul.mubr.f32.gmra.mxu0 %v1931_v58 }
 0x347   : > { %v1932_v45 = vmax.f32 %v1886_v54, 0.0  ;;  %v1901_v17 = vadd.f32 %v2692_v39, %v3965_v51 }
 0x348   : > { %v1895_v20 = vpop.f32.mrf.mxu1 }
 0x349   : > { %v1896_v57 = vadd.f32 %v3965_v51, %v1895_v20  ;;  %2767 = vmatprep.mubr.f32.mxu0 %v1932_v45  ;;  %v1935_v8 = vmax.f32 %v1901_v17, 0.0 }
 0x34a   : > { %2768 = vmatmul.mubr.f32.gmra.mxu0 %v1933_v43 }
 0x34b   : > { %v1934_v28 = vmax.f32 %v1896_v57, 0.0 }
 0x34d   : > { %2770 = vmatprep.mubr.f32.mxu0 %v1934_v28 }
 0x34e   : > { %2771 = vmatmul.mubr.f32.gmra.mxu0 %v1935_v8 }
 0x3c4   : > { %v2727_v63 = vpop.f32.mrf.mxu0 }
 0x3c5   : > { %v2031_v59 = vadd.f32 %v2727_v63, %v4000_v52 }
 0x3c6   : > { %v2025_v1 = vpop.f32.mrf.mxu0 }
 0x3c7   : > { %2185 = vst [vmem:[%s4003_s20 + $0x8] sm:$0xff] %v2031_v59  ;;  %v2026_v51 = vadd.f32 %v4000_v52, %v2025_v1 }
 0x3c8   : > { %v2730_v3 = vpop.f32.mrf.mxu0 }
 0x3c9   : > { %2184 = vst [vmem:[%s4003_s20] sm:$0xff] %v2026_v51  ;;  %v2041_v55 = vadd.f32 %v2730_v3, %v4000_v52 }
 0x3ca   : > { %v2035_v60 = vpop.f32.mrf.mxu0 }
 0x3cb   : > { %2187 = vst [vmem:[%s4003_s20 + $0x18] sm:$0xff] %v2041_v55  ;;  %v2036_v24 = vadd.f32 %v4000_v52, %v2035_v60 }
 0x3cc   : > { %v2733_v61 = vpop.f32.mrf.mxu0 }
 0x3cd   : > { %2186 = vst [vmem:[%s4003_s20 + $0x10] sm:$0xff] %v2036_v24  ;;  %v2051_v35 = vadd.f32 %v2733_v61, %v4000_v52 }
 0x3ce   : > { %v2045_v13 = vpop.f32.mrf.mxu0 }
 0x3cf   : > { %2189 = vst [vmem:[%s4003_s20 + $0x28] sm:$0xff] %v2051_v35  ;;  %v2046_v9 = vadd.f32 %v4000_v52, %v2045_v13 }
 0x3d0   : > { %v2736_v5 = vpop.f32.mrf.mxu0 }
 0x3d1   : > { %2188 = vst [vmem:[%s4003_s20 + $0x20] sm:$0xff] %v2046_v9  ;;  %v2061_v49 = vadd.f32 %v2736_v5, %v4000_v52 }
 0x3d2   : > { %v2055_v14 = vpop.f32.mrf.mxu0 }
 0x3d3   : > { %2191 = vst [vmem:[%s4003_s20 + $0x38] sm:$0xff] %v2061_v49  ;;  %v2056_v26 = vadd.f32 %v4000_v52, %v2055_v14 }
 0x3d4   : > { %v2739_v11 = vpop.f32.mrf.mxu0 }
 0x3d5   : > { %2190 = vst [vmem:[%s4003_s20 + $0x30] sm:$0xff] %v2056_v26  ;;  %v2071_v15 = vadd.f32 %v2739_v11, %v4000_v52 }
 0x3d6   : > { %v2065_v50 = vpop.f32.mrf.mxu0 }
 0x3d7   : > { %2193 = vst [vmem:[%s4003_s20 + $0x48] sm:$0xff] %v2071_v15  ;;  %v2066_v6 = vadd.f32 %v4000_v52, %v2065_v50 }
 0x3d8   : > { %v2742_v16 = vpop.f32.mrf.mxu0 }
 0x3d9   : > { %2192 = vst [vmem:[%s4003_s20 + $0x40] sm:$0xff] %v2066_v6  ;;  %v2081_v2 = vadd.f32 %v2742_v16, %v4000_v52 }
 0x3da   : > { %v2075_v18 = vpop.f32.mrf.mxu0 }
 0x3db   : > { %2195 = vst [vmem:[%s4003_s20 + $0x58] sm:$0xff] %v2081_v2  ;;  %v2076_v33 = vadd.f32 %v4000_v52, %v2075_v18 }
 0x3dc   : > { %v2745_v12 = vpop.f32.mrf.mxu0 }
 0x3dd   : > { %2194 = vst [vmem:[%s4003_s20 + $0x50] sm:$0xff] %v2076_v33  ;;  %v2091_v19 = vadd.f32 %v2745_v12, %v4000_v52 }
 0x3de   : > { %v2085_v21 = vpop.f32.mrf.mxu0 }
 0x3df   : > { %2197 = vst [vmem:[%s4003_s20 + $0x68] sm:$0xff] %v2091_v19  ;;  %v2086_v32 = vadd.f32 %v4000_v52, %v2085_v21 }
 0x3e0   : > { %v2748_v56 = vpop.f32.mrf.mxu0 }
 0x3e1   : > { %2196 = vst [vmem:[%s4003_s20 + $0x60] sm:$0xff] %v2086_v32  ;;  %v2101_v40 = vadd.f32 %v2748_v56, %v4000_v52 }
 0x3e2   : > { %v2095_v23 = vpop.f32.mrf.mxu0 }
 0x3e3   : > { %2199 = vst [vmem:[%s4003_s20 + $0x78] sm:$0xff] %v2101_v40  ;;  %v2096_v25 = vadd.f32 %v4000_v52, %v2095_v23 }
 0x3e5   : > { %2198 = vst [vmem:[%s4003_s20 + $0x70] sm:$0xff] %v2096_v25 }
 0x3e6   : > { %v2751_v22 = vpop.f32.mrf.mxu0 }
 0x3e7   : > { %v2111_v10 = vadd.f32 %v2751_v22, %v4000_v52 }
 0x3e8   : > { %v2105_v47 = vpop.f32.mrf.mxu0 }
 0x3e9   : > { %2201 = vst [vmem:[%s4003_s20 + $0x88] sm:$0xff] %v2111_v10  ;;  %v2106_v62 = vadd.f32 %v4000_v52, %v2105_v47 }
 0x3eb   : > { %2200 = vst [vmem:[%s4003_s20 + $0x80] sm:$0xff] %v2106_v62 }
 0x3ee   : > { %v2754_v31 = vpop.f32.mrf.mxu0 }
 0x3ef   : > { %v2121_v44 = vadd.f32 %v2754_v31, %v4000_v52 }
 0x3f0   : > { %v2115_v42 = vpop.f32.mrf.mxu0 }
 0x3f1   : > { %2203 = vst [vmem:[%s4003_s20 + $0x98] sm:$0xff] %v2121_v44  ;;  %v2116_v34 = vadd.f32 %v4000_v52, %v2115_v42 }
 0x3f3   : > { %2202 = vst [vmem:[%s4003_s20 + $0x90] sm:$0xff] %v2116_v34 }
 0x3f6   : > { %v2757_v30 = vpop.f32.mrf.mxu0 }
 0x3f7   : > { %v2131_v36 = vadd.f32 %v2757_v30, %v4000_v52 }
 0x3f8   : > { %v2125_v29 = vpop.f32.mrf.mxu0 }
 0x3f9   : > { %2205 = vst [vmem:[%s4003_s20 + $0xa8] sm:$0xff] %v2131_v36  ;;  %v2126_v38 = vadd.f32 %v4000_v52, %v2125_v29 }
 0x3fb   : > { %2204 = vst [vmem:[%s4003_s20 + $0xa0] sm:$0xff] %v2126_v38 }
 0x3fe   : > { %v2760_v41 = vpop.f32.mrf.mxu0 }
 0x3ff   : > { %v2141_v27 = vadd.f32 %v2760_v41, %v4000_v52 }
 0x400   : > { %v2135_v4 = vpop.f32.mrf.mxu0 }
 0x401   : > { %2207 = vst [vmem:[%s4003_s20 + $0xb8] sm:$0xff] %v2141_v27  ;;  %v2136_v0 = vadd.f32 %v4000_v52, %v2135_v4 }
 0x402   : > { %v2763_v7 = vpop.f32.mrf.mxu0 }
 0x403   : > { %2206 = vst [vmem:[%s4003_s20 + $0xb0] sm:$0xff] %v2136_v0  ;;  %v2151_v37 = vadd.f32 %v2763_v7, %v4000_v52 }
 0x404   : > { %v2145_v46 = vpop.f32.mrf.mxu0 }
 0x405   : > { %2209 = vst [vmem:[%s4003_s20 + $0xc8] sm:$0xff] %v2151_v37  ;;  %v2146_v58 = vadd.f32 %v4000_v52, %v2145_v46 }
 0x406   : > { %v2766_v48 = vpop.f32.mrf.mxu0 }
 0x407   : > { %2208 = vst [vmem:[%s4003_s20 + $0xc0] sm:$0xff] %v2146_v58  ;;  %v2161_v53 = vadd.f32 %v2766_v48, %v4000_v52 }
 0x408   : > { %v2155_v54 = vpop.f32.mrf.mxu0 }
 0x409   : > { %2211 = vst [vmem:[%s4003_s20 + $0xd8] sm:$0xff] %v2161_v53  ;;  %v2156_v39 = vadd.f32 %v4000_v52, %v2155_v54 }
 0x40a   : > { %v2769_v45 = vpop.f32.mrf.mxu0 }
 0x40b   : > { %2210 = vst [vmem:[%s4003_s20 + $0xd0] sm:$0xff] %v2156_v39  ;;  %v2171_v43 = vadd.f32 %v2769_v45, %v4000_v52 }
 0x40c   : > { %v2165_v17 = vpop.f32.mrf.mxu0 }
 0x40d   : > { %2213 = vst [vmem:[%s4003_s20 + $0xe8] sm:$0xff] %v2171_v43  ;;  %v2166_v20 = vadd.f32 %v4000_v52, %v2165_v17 }
 0x40e   : > { %v2772_v57 = vpop.f32.mrf.mxu0 }
 0x40f   : > { %2212 = vst [vmem:[%s4003_s20 + $0xe0] sm:$0xff] %v2166_v20  ;;  %v2181_v28 = vadd.f32 %v2772_v57, %v4000_v52 }
 0x410   : > { %v2175_v8 = vpop.f32.mrf.mxu0 }
 0x411   : > { %2215 = vst [vmem:[%s4003_s20 + $0xf8] sm:$0xff] %v2181_v28  ;;  %v2176_v63 = vadd.f32 %v4000_v52, %v2175_v8 }
 0x413   : > { %2214 = vst [vmem:[%s4003_s20 + $0xf0] sm:$0xff] %v2176_v63 }
 0x414   : > { %3151 = shalt.err (!%p3148_p3)
}
 0x415   : > { %s3152_s22 = scalar_lea.hbm %s4070_s21, 4096  ;;  %s3156_s8 = scalar_lea.hbm %s4125_s7, 8192 }
 0x416   : > { %p3153_p2 = scmp.ne.s32.totalorder %s4070_s21, %s3152_s22  ;;  %p3157_p9 = scmp.lt.s32.totalorder %s4070_s21, %s4125_s7 }
 0x417   : > { %p3158_p12 = scmp.lt.s32.totalorder %s3156_s8, %s3152_s22 }
 0x418   : > { %p3154_p4 = pnand %p3153_p2, %p4148_p6 }
 0x419   : > { %p3159_p0 = por %p3158_p12, %p3157_p9 }
 0x41a   : > { %p3155_p1 = pneg %p3154_p4 }
 0x41c   : > { %p3160_p13 = pnand %p3159_p0, %p3155_p1 }
 0x41e   : > { %3163 = shalt.err (!%p3160_p13)
}
 0x41f   : > { %s3229_s12 = smov 128   ;;  %s3230_s14 = smov 8  }
 0x420   : > { %2866 = dma.vmem_to_hbm [thread:$0]  (%p4148_p6), %s4072_s9, 4096, %s4070_s21, %s2217_s30, %s3229_s12, %s3229_s12, %s3230_s14  }
 0x421 PF: > { %s2245_s10 = sand.u32 1, %s3202_s24   ;;  %p4149_p5 = scmp.ne.s32.totalorder %s4138_s17, 0 }
 0x422   : > { %p4150_p8 = scmp.ge.s32.totalorder %s3214_s27, 2  ;;  %s2246_s18 = scalar_lea.sflag [#allocation4], %s2245_s10 }
 0x424   : > { %p2892_p7 = pnand %p4150_p8, %p4149_p5 }
 0x426   : > { %p2893_p11 = pneg %p2892_p7 }
 0x428   : > { %3197 = dma.done.wait (%p2893_p11), %s2246_s18, 4096  }
 0x429   : > { %3199 = vsyncadd (%p2893_p11), %s2246_s18, 4294963200  ;;  %p23_p10 = scmp.ge.s32.totalorder %s3374_s11, 4   ;;  %s4151_s24 = smov %s3206_s25 }
 0x42a   : > { %s4152_s25 = smov %s3210_s26  ;;  %s4153_s26 = smov %s3385_s19 }
 0x42b   : > { %s4154_s27 = smov %s3374_s11  ;;  %25 = sbr.rel (!%p23_p10) target bundleno = 10 (0xa), region = 117 }
 0x430   :  { %2251 = vsyncpa [#allocation3], 1 }
 0x431   :  { %2253 = vsyncpa [#allocation3 + $0x1], 1 }
 0x432   :  { %2254 = vsyncpa [#allocation6], 1 }
 0x433   :  { %2255 = vsyncpa [#allocation9], 1 }
 0x434   :  { %2256 = vsyncpa [#allocation12], 1 }
 0x435   :  { %2257 = vsyncpa [#allocation4], 1 }
 0x436   :  { %2259 = vsyncpa [#allocation4 + $0x1], 1 }

</bundles_post_ra>
